<compile_context>
chip_gen: v6e
topology: v6e:2x2x1
jax: 0.10.0
libtpu: 0.0.40
codegen_flags: <defaults>
</compile_context>

<pallas_src>
import numpy as np
import jax
import jax.numpy as jnp
from jax.experimental import pallas as pl
from jax.experimental.pallas import tpu as pltpu

try:
    from scipy.optimize import linear_sum_assignment as _scipy_lsa
except Exception:  # scipy not installed in the sandbox
    _scipy_lsa = None


# ---------------------------------------------------------------------------
# Pallas kernel: pairwise Euclidean distance (cdist, metric='euclidean')
# ---------------------------------------------------------------------------
def _cdist_kernel(a_ref, bT_ref, d_ref):
    # a_ref : (tile_n, D)  rows of gt_pc
    # bT_ref: (D, Mp)      columns of gen_pc^T (full padded width, lane-dense)
    # d_ref : (tile_n, Mp) output distances (accumulated in place)
    D = a_ref.shape[1]
    diff = a_ref[:, 0:1] - bT_ref[0:1, :]        # (tn,1)-(1,Mp) -> (tn,Mp)
    d_ref[...] = diff * diff
    for k in range(1, D):                        # D is tiny (3): static unroll, VPU
        diff = a_ref[:, k:k + 1] - bT_ref[k:k + 1, :]
        d_ref[...] += diff * diff
    d_ref[...] = jnp.sqrt(d_ref[...])            # EUP


def _round_up(x, m):
    return ((x + m - 1) // m) * m


def pairwise_euclidean(a, b):
    """a: (N, D), b: (M, D) -> (N, M) float32 Euclidean distance matrix."""
    a = jnp.asarray(a, jnp.float32)
    b = jnp.asarray(b, jnp.float32)
    N, D = a.shape
    M = b.shape[0]

    # Lane-dense output: pad M to a multiple of 128, single block over the full
    # padded width -> unmasked vst stores.
    Mp = max(_round_up(M, 128), 128)

    # Row blocking: one block when small, else a handful of 512-row blocks.
    #   - keeps per-block output at <= 512*Mp*4 bytes (~2 MiB for Mp=1024),
    #     comfortably inside v5e's 16 MiB default scoped VMEM with double
    #     buffering,
    #   - gives >= 2 grid steps for the 1000-point case so v7x's two
    #     TensorCores both get work ("parallel" grid axis).
    if N <= 512:
        Np = max(_round_up(N, 8), 8)
        tile_n = Np
    else:
        tile_n = 512
        Np = _round_up(N, tile_n)

    # Pad to block multiples (padded rows/cols are sliced away afterwards).
    a_p = jnp.zeros((Np, D), jnp.float32).at[:N, :].set(a)
    bT_p = jnp.zeros((D, Mp), jnp.float32).at[:, :M].set(b.T)

    grid = (Np // tile_n,)
    d = pl.pallas_call(
        _cdist_kernel,
        out_shape=jax.ShapeDtypeStruct((Np, Mp), jnp.float32),
        grid_spec=pltpu.PrefetchScalarGridSpec(
            num_scalar_prefetch=0,
            grid=grid,
            in_specs=[
                pl.BlockSpec((tile_n, D), lambda i: (i, 0)),
                pl.BlockSpec((D, Mp), lambda i: (0, 0)),
            ],
            out_specs=pl.BlockSpec((tile_n, Mp), lambda i: (i, 0)),
        ),
        compiler_params=pltpu.CompilerParams(
            dimension_semantics=("parallel",)),
    )(a_p, bT_p)
    return d[:N, :M]


# Single jit over the O(N*3) glue + the pallas_call: removes per-op dispatch.
@jax.jit
def _emd_distance_matrix(registration_pred, registration_gt, coords):
    c = jnp.squeeze(coords)
    gt_pc = (c + jnp.squeeze(registration_gt))[:1000]
    gen_pc = (c + jnp.squeeze(registration_pred))[:1000]
    return pairwise_euclidean(gt_pc, gen_pc)


# ---------------------------------------------------------------------------
# Host-side exact linear sum assignment fallback
# (== scipy.optimize.linear_sum_assignment; used only if scipy is unavailable)
# ---------------------------------------------------------------------------
# TODO(synk): Hungarian assignment is a sequential combinatorial algorithm with
# no clean Pallas equivalent; it stays on host (scipy C impl preferred).
def _linear_sum_assignment(cost):
    cost = np.asarray(cost, dtype=np.float64)
    n, m = cost.shape
    assert n == m, "EMD point clouds have equal size"
    INF = np.inf
    u = np.zeros(n + 1)
    v = np.zeros(m + 1)
    p = np.zeros(m + 1, dtype=np.int64)      # p[j] = row (1-indexed) assigned to col j
    way = np.zeros(m + 1, dtype=np.int64)
    for i in range(1, n + 1):
        p[0] = i
        j0 = 0
        minv = np.full(m + 1, INF)
        used = np.zeros(m + 1, dtype=bool)
        while True:
            used[j0] = True
            i0 = p[j0]
            cur = cost[i0 - 1, :] - u[i0] - v[1:]
            free = ~used[1:]
            better = free & (cur < minv[1:])
            mv = minv[1:]       # views: writes go through to minv/way
            wy = way[1:]
            mv[better] = cur[better]
            wy[better] = j0
            masked = np.where(free, minv[1:], INF)
            j1 = int(np.argmin(masked)) + 1
            delta = masked[j1 - 1]
            used_idx = np.nonzero(used)[0]
            u[p[used_idx]] += delta
            v[used_idx] -= delta
            minv[~used] -= delta
            j0 = j1
            if p[j0] == 0:
                break
        while True:   # augment along the alternating path
            j1 = way[j0]
            p[j0] = p[j1]
            j0 = j1
            if j0 == 0:
                break
    col4row = np.zeros(n, dtype=np.int64)
    for j in range(1, m + 1):
        if p[j] > 0:
            col4row[p[j] - 1] = j - 1
    return np.arange(n), col4row


# ---------------------------------------------------------------------------
# EarthMoversDistance.forward equivalent
# ---------------------------------------------------------------------------
def earth_movers_distance(registration_pred, registration_gt, coords, wandb=None):
    d = _emd_distance_matrix(registration_pred, registration_gt, coords)  # Pallas hot path
    d_np = np.asarray(jax.block_until_ready(d))
    if _scipy_lsa is not None:
        row_ind, col_ind = _scipy_lsa(d_np)
    else:
        row_ind, col_ind = _linear_sum_assignment(d_np)
    return float(d_np[row_ind, col_ind].mean())


if __name__ == "__main__":
    key = jax.random.PRNGKey(0)
    k1, k2, k3 = jax.random.split(key, 3)

    N, D = 200, 3   # small point cloud; forward slices [:1000] so all points used
    coords = jax.random.uniform(k1, (1, N, D), dtype=jnp.float32)
    registration_gt = 0.05 * jax.random.normal(k2, (1, N, D), dtype=jnp.float32)
    registration_pred = 0.05 * jax.random.normal(k3, (1, N, D), dtype=jnp.float32)

    # Kernel correctness check against a pure-JAX cdist reference.
    gt_pc = jnp.squeeze(coords) + jnp.squeeze(registration_gt)
    gen_pc = jnp.squeeze(coords) + jnp.squeeze(registration_pred)
    d_kernel = jax.block_until_ready(pairwise_euclidean(gt_pc, gen_pc))
    d_ref = jnp.sqrt(
        jnp.sum((gt_pc[:, None, :] - gen_pc[None, :, :]) ** 2, axis=-1))
    err = float(jnp.max(jnp.abs(d_kernel - d_ref)))
    if err > 1e-4:
        raise AssertionError(f"cdist kernel mismatch, max abs err = {err}")

    emd = earth_movers_distance(registration_pred, registration_gt, coords, wandb=None)
    assert np.isfinite(emd)
    print("KERNEL_OK")
</pallas_src>

<mosaic_0001>
module attributes {stable_mosaic.version = 11 : i64} {
  func.func @_cdist_kernel(%arg0: i32, %arg1: memref<200x3xf32, #tpu.memory_space<vmem>>, %arg2: memref<3x256xf32, #tpu.memory_space<vmem>>, %arg3: memref<200x256xf32, #tpu.memory_space<vmem>>) attributes {dimension_semantics = [#tpu.dimension_semantics<parallel>], iteration_bounds = array<i64: 1>, scalar_prefetch = 0 : i64, scratch_operands = 0 : i64, tpu.core_type = #tpu.core_type<tc>, window_params = [{transform_indices = @transform_0, window_bounds = array<i64: 200, 3>}, {pipeline_mode = #tpu.pipeline_mode<synchronous>, transform_indices = @transform_1, window_bounds = array<i64: 3, 256>}, {transform_indices = @transform_2, window_bounds = array<i64: 200, 256>}]} {
    %c0 = arith.constant 0 : index
    %c0_0 = arith.constant 0 : index
    %0 = vector.load %arg1[%c0, %c0_0] : memref<200x3xf32, #tpu.memory_space<vmem>>, vector<200x1xf32>
    %c0_1 = arith.constant 0 : index
    %c0_2 = arith.constant 0 : index
    %1 = vector.load %arg2[%c0_1, %c0_2] : memref<3x256xf32, #tpu.memory_space<vmem>>, vector<1x256xf32>
    %2 = vector.broadcast %0 : vector<200x1xf32> to vector<200x256xf32>
    %3 = vector.broadcast %1 : vector<1x256xf32> to vector<200x256xf32>
    %4 = arith.subf %2, %3 : vector<200x256xf32>
    %5 = arith.mulf %4, %4 : vector<200x256xf32>
    %c0_3 = arith.constant 0 : index
    %c0_4 = arith.constant 0 : index
    %6 = vector.load %arg3[%c0_3, %c0_4] : memref<200x256xf32, #tpu.memory_space<vmem>>, vector<200x256xf32>
    tpu.vector_store %arg3[%c0_3, %c0_4], %5 {strides = array<i32>} : memref<200x256xf32, #tpu.memory_space<vmem>>, vector<200x256xf32>,
    %c0_5 = arith.constant 0 : index
    %c1 = arith.constant 1 : index
    %7 = vector.load %arg1[%c0_5, %c1] : memref<200x3xf32, #tpu.memory_space<vmem>>, vector<200x1xf32>
    %c1_6 = arith.constant 1 : index
    %c0_7 = arith.constant 0 : index
    %8 = vector.load %arg2[%c1_6, %c0_7] : memref<3x256xf32, #tpu.memory_space<vmem>>, vector<1x256xf32>
    %9 = vector.broadcast %7 : vector<200x1xf32> to vector<200x256xf32>
    %10 = vector.broadcast %8 : vector<1x256xf32> to vector<200x256xf32>
    %11 = arith.subf %9, %10 : vector<200x256xf32>
    %c0_8 = arith.constant 0 : index
    %c0_9 = arith.constant 0 : index
    %12 = vector.load %arg3[%c0_8, %c0_9] : memref<200x256xf32, #tpu.memory_space<vmem>>, vector<200x256xf32>
    %13 = arith.mulf %11, %11 : vector<200x256xf32>
    %14 = arith.addf %12, %13 : vector<200x256xf32>
    %c0_10 = arith.constant 0 : index
    %c0_11 = arith.constant 0 : index
    %15 = vector.load %arg3[%c0_10, %c0_11] : memref<200x256xf32, #tpu.memory_space<vmem>>, vector<200x256xf32>
    tpu.vector_store %arg3[%c0_10, %c0_11], %14 {strides = array<i32>} : memref<200x256xf32, #tpu.memory_space<vmem>>, vector<200x256xf32>,
    %c0_12 = arith.constant 0 : index
    %c2 = arith.constant 2 : index
    %16 = vector.load %arg1[%c0_12, %c2] : memref<200x3xf32, #tpu.memory_space<vmem>>, vector<200x1xf32>
    %c2_13 = arith.constant 2 : index
    %c0_14 = arith.constant 0 : index
    %17 = vector.load %arg2[%c2_13, %c0_14] : memref<3x256xf32, #tpu.memory_space<vmem>>, vector<1x256xf32>
    %18 = vector.broadcast %16 : vector<200x1xf32> to vector<200x256xf32>
    %19 = vector.broadcast %17 : vector<1x256xf32> to vector<200x256xf32>
    %20 = arith.subf %18, %19 : vector<200x256xf32>
    %c0_15 = arith.constant 0 : index
    %c0_16 = arith.constant 0 : index
    %21 = vector.load %arg3[%c0_15, %c0_16] : memref<200x256xf32, #tpu.memory_space<vmem>>, vector<200x256xf32>
    %22 = arith.mulf %20, %20 : vector<200x256xf32>
    %23 = arith.addf %21, %22 : vector<200x256xf32>
    %c0_17 = arith.constant 0 : index
    %c0_18 = arith.constant 0 : index
    %24 = vector.load %arg3[%c0_17, %c0_18] : memref<200x256xf32, #tpu.memory_space<vmem>>, vector<200x256xf32>
    tpu.vector_store %arg3[%c0_17, %c0_18], %23 {strides = array<i32>} : memref<200x256xf32, #tpu.memory_space<vmem>>, vector<200x256xf32>,
    %c0_19 = arith.constant 0 : index
    %c0_20 = arith.constant 0 : index
    %25 = vector.load %arg3[%c0_19, %c0_20] : memref<200x256xf32, #tpu.memory_space<vmem>>, vector<200x256xf32>
    %26 = math.sqrt %25 : vector<200x256xf32>
    %c0_21 = arith.constant 0 : index
    %c0_22 = arith.constant 0 : index
    %27 = vector.load %arg3[%c0_21, %c0_22] : memref<200x256xf32, #tpu.memory_space<vmem>>, vector<200x256xf32>
    tpu.vector_store %arg3[%c0_21, %c0_22], %26 {strides = array<i32>} : memref<200x256xf32, #tpu.memory_space<vmem>>, vector<200x256xf32>,
    return
  }
  func.func @transform_0(%arg0: i32) -> (i32, i32) {
    %c0_i32 = arith.constant 0 : i32
    %c0_i32_0 = arith.constant 0 : i32
    return %arg0, %c0_i32 : i32, i32
  }
  func.func @transform_1(%arg0: i32) -> (i32, i32) {
    %c0_i32 = arith.constant 0 : i32
    %c0_i32_0 = arith.constant 0 : i32
    %c0_i32_1 = arith.constant 0 : i32
    return %c0_i32, %c0_i32_0 : i32, i32
  }
  func.func @transform_2(%arg0: i32) -> (i32, i32) {
    %c0_i32 = arith.constant 0 : i32
    %c0_i32_0 = arith.constant 0 : i32
    return %arg0, %c0_i32 : i32, i32
  }
}

</mosaic_0001>

<bundles_post_ra>
// kernel: tpu_custom_call.1
= control target key start
LH: loop header
LB: loop body
LE: loop exit
PB: predicated region body
PF: predicated region fallthrough
CT: control target
= control target key end

     0   :  { %v1752_v2 = vmov 0   ;;  %s2986_s0 = inlined_call_operand.vmem [shape: f32[200,3], index: 0, kind: input, shape index: {}]   ;;  %s2987_s1 = inlined_call_operand.vmem [shape: f32[3,256], index: 1, kind: input, shape index: {}]   ;;  %s2988_s2 = inlined_call_operand.hbm [shape: f32[200,256], index: 2, kind: output, shape index: {}]  }
   0x1   :  { %v1776_v0 = vld [vmem:[%s2986_s0 + $0x10] sm:$0xff]  ;;  %v1781_v1 = vld [vmem:[%s2986_s0] sm:$0xff]  ;;  %1625 = vset.pattern.permute.xlu1 %v1752_v2  ;;  %1624 = vset.pattern.permute.xlu0 %v1752_v2  ;;  %v1788_v3 = vld [vmem:[%s2986_s0 + $0x18] sm:$0xff] }
   0x2   :  { %50 = vperm.xlu1 %1625, %v1776_v0   ;;  %40 = vperm.xlu0 %1624, %v1781_v1   ;;  %v1793_v4 = vld [vmem:[%s2986_s0 + $0x8] sm:$0xff]  ;;  %v1805_v6 = vld [vmem:[%s2986_s0 + $0x20] sm:$0xff] }
   0x3   :  { %v1800_v5 = vld [vmem:[%s2986_s0 + $0x28] sm:$0xff] }
   0x6   :  { %55 = vperm.xlu1 %1625, %v1788_v3   ;;  %45 = vperm.xlu0 %1624, %v1793_v4  }
   0x7   :  { %7 = vsyncpa [#allocation3], 0  ;;  %v1812_v7 = vld [vmem:[%s2986_s0 + $0x38] sm:$0xff]  ;;  %v1817_v8 = vld [vmem:[%s2986_s0 + $0x30] sm:$0xff]  ;;  %v1753_v26 = vmov 1   ;;  %v1754_v27 = vmov 2   ;;  %v164_v30 = vlaneseq }
   0x8   :  { %v1824_v9 = vld [vmem:[%s2986_s0 + $0x48] sm:$0xff]  ;;  %v1829_v10 = vld [vmem:[%s2986_s0 + $0x40] sm:$0xff]  ;;  %v1836_v11 = vld [vmem:[%s2986_s0 + $0x58] sm:$0xff] }
   0x9   :  { %v1841_v12 = vld [vmem:[%s2986_s0 + $0x50] sm:$0xff]  ;;  %v1848_v13 = vld [vmem:[%s2986_s0 + $0x68] sm:$0xff]  ;;  %v1853_v14 = vld [vmem:[%s2986_s0 + $0x60] sm:$0xff]  ;;  %v165_v33 = vshrl.u32 %v164_v30, 7 }
   0xa   :  { %65 = vperm.xlu1 %1625, %v1800_v5   ;;  %60 = vperm.xlu0 %1624, %v1805_v6   ;;  %v1860_v15 = vld [vmem:[%s2986_s0 + $0x78] sm:$0xff]  ;;  %v1865_v16 = vld [vmem:[%s2986_s0 + $0x70] sm:$0xff]  ;;  %v1872_v17 = vld [vmem:[%s2986_s0 + $0x88] sm:$0xff] }
   0xb   :  { %v1877_v18 = vld [vmem:[%s2986_s0 + $0x80] sm:$0xff]  ;;  %v1884_v19 = vld [vmem:[%s2986_s0 + $0x98] sm:$0xff]  ;;  %v1889_v20 = vld [vmem:[%s2986_s0 + $0x90] sm:$0xff]  ;;  %v166_v36 = vsub.s32 0, %v165_v33  ;;  %v170_v37 = vsub.s32 1, %v165_v33 }
   0xc   :  { %v1896_v21 = vld [vmem:[%s2986_s0 + $0xa8] sm:$0xff]  ;;  %v1901_v22 = vld [vmem:[%s2986_s0 + $0xa0] sm:$0xff]  ;;  %v1908_v23 = vld [vmem:[%s2986_s0 + $0xb8] sm:$0xff] }
   0xd   :  { %v1913_v24 = vld [vmem:[%s2986_s0 + $0xb0] sm:$0xff]  ;;  %v1920_v25 = vld [vmem:[%s2986_s0 + $0xc0] sm:$0xff] }
   0xe   :  { %75 = vperm.xlu1 %1625, %v1812_v7   ;;  %70 = vperm.xlu0 %1624, %v1817_v8   ;;  %v37_v38 = vld [vmem:[%s2987_s1] ss:$4 sm:$0x3] }
   0xf   :  { %v1973_v41 = vrot.slane %v37_v38, %v166_v36  ;;  %v1975_v42 = vrot.slane %v37_v38, %v170_v37 }
  0x12   :  { %85 = vperm.xlu1 %1625, %v1824_v9   ;;  %80 = vperm.xlu0 %1624, %v1829_v10  }
  0x16   :  { %95 = vperm.xlu1 %1625, %v1836_v11   ;;  %90 = vperm.xlu0 %1624, %v1841_v12  }
  0x1a   :  { %105 = vperm.xlu1 %1625, %v1848_v13   ;;  %100 = vperm.xlu0 %1624, %v1853_v14  }
  0x1e   :  { %115 = vperm.xlu1 %1625, %v1860_v15   ;;  %110 = vperm.xlu0 %1624, %v1865_v16  }
  0x22   :  { %125 = vperm.xlu1 %1625, %v1872_v17   ;;  %120 = vperm.xlu0 %1624, %v1877_v18  }
  0x26   :  { %135 = vperm.xlu1 %1625, %v1884_v19   ;;  %130 = vperm.xlu0 %1624, %v1889_v20  }
  0x2a   :  { %145 = vperm.xlu1 %1625, %v1896_v21   ;;  %140 = vperm.xlu0 %1624, %v1901_v22  }
  0x2e   :  { %155 = vperm.xlu1 %1625, %v1908_v23   ;;  %150 = vperm.xlu0 %1624, %v1913_v24  }
  0x32   :  { %1626 = vset.pattern.permute.xlu1 %v1753_v26  ;;  %160 = vperm.xlu0 %1624, %v1920_v25  }
  0x33   :  { %353 = vperm.xlu1 %1626, %v1781_v1  }
  0x36   :  { %1627 = vset.pattern.permute.xlu0 %v1753_v26 }
  0x37   :  { %363 = vperm.xlu1 %1626, %v1776_v0   ;;  %358 = vperm.xlu0 %1627, %v1793_v4  }
  0x3b   :  { %368 = vperm.xlu1 %1626, %v1788_v3   ;;  %373 = vperm.xlu0 %1627, %v1805_v6  }
  0x3f   :  { %378 = vperm.xlu1 %1626, %v1800_v5   ;;  %383 = vperm.xlu0 %1627, %v1817_v8  }
  0x43   :  { %388 = vperm.xlu1 %1626, %v1812_v7   ;;  %393 = vperm.xlu0 %1627, %v1829_v10  }
  0x47   :  { %398 = vperm.xlu1 %1626, %v1824_v9   ;;  %403 = vperm.xlu0 %1627, %v1841_v12  }
  0x4b   :  { %408 = vperm.xlu1 %1626, %v1836_v11   ;;  %413 = vperm.xlu0 %1627, %v1853_v14  }
  0x4f   :  { %418 = vperm.xlu1 %1626, %v1848_v13   ;;  %423 = vperm.xlu0 %1627, %v1865_v16  }
  0x53   :  { %428 = vperm.xlu1 %1626, %v1860_v15   ;;  %433 = vperm.xlu0 %1627, %v1877_v18  }
  0x57   :  { %438 = vperm.xlu1 %1626, %v1872_v17   ;;  %443 = vperm.xlu0 %1627, %v1889_v20  }
  0x5b   :  { %448 = vperm.xlu1 %1626, %v1884_v19   ;;  %453 = vperm.xlu0 %1627, %v1901_v22  }
  0x5f   :  { %458 = vperm.xlu1 %1626, %v1896_v21   ;;  %463 = vperm.xlu0 %1627, %v1913_v24  }
  0x63   :  { %468 = vperm.xlu1 %1626, %v1908_v23   ;;  %473 = vperm.xlu0 %1627, %v1920_v25  }
  0x67   :  { %1628 = vset.pattern.permute.xlu1 %v1754_v27  ;;  %1629 = vset.pattern.permute.xlu0 %v1754_v27 }
  0x68   :  { %766 = vperm.xlu1 %1628, %v1781_v1   ;;  %771 = vperm.xlu0 %1629, %v1793_v4   ;;  %v1616_v4 = vld [vmem:[%s2987_s1 + $0x1] ss:$4 sm:$0x3] }
  0x6c   :  { %776 = vperm.xlu1 %1628, %v1776_v0   ;;  %786 = vperm.xlu0 %1629, %v1805_v6  }
  0x70   :  { %781 = vperm.xlu1 %1628, %v1788_v3   ;;  %796 = vperm.xlu0 %1629, %v1817_v8  }
  0x74   :  { %791 = vperm.xlu1 %1628, %v1800_v5   ;;  %806 = vperm.xlu0 %1629, %v1829_v10   ;;  %v1617_v5 = vld [vmem:[%s2987_s1 + $0x2] ss:$4 sm:$0x3]  ;;  %s1755_s1 = smov [#allocation2]  }
  0x75   :  { %s1605_s8 = sshll.u32 %s1755_s1, 4  ;;  %s1606_s8 = int_to_ptr.vmem [resolvable:$true] %s1605_s8 }
  0x76   :  { %s1730_s9 = scalar_lea.vmem %s1606_s8, 6400  ;;  %p1735_p1 = scmp.lt.s32.totalorder %s1606_s8, %s1606_s8 }
  0x77   :  { %p1731_p0 = scmp.ne.s32.totalorder %s1606_s8, %s1730_s9  ;;  %p1736_p2 = scmp.lt.s32.totalorder %s1730_s9, %s1730_s9 }
  0x78   :  { %801 = vperm.xlu1 %1628, %v1812_v7   ;;  %816 = vperm.xlu0 %1629, %v1841_v12   ;;  %v2047_v12 = vrot.slane %v1616_v4, %v166_v36 }
  0x79   :  { %p1737_p3 = por %p1736_p2, %p1735_p1 }
  0x7b   :  { %p1738_p4 = pnand %p1737_p3, %p1731_p0 }
  0x7c   :  { %811 = vperm.xlu1 %1628, %v1824_v9   ;;  %826 = vperm.xlu0 %1629, %v1853_v14  }
  0x7d   :  { %v51_v28 = vpop.permute.xlu1 %50  ;;  %v41_v29 = vpop.permute.xlu0 %40 }
  0x7e   :  { %v178_v6 = vsub.f32 %v51_v28, %v1973_v41  ;;  %v179_v7 = vsub.f32 %v51_v28, %v1975_v42  ;;  %v174_v8 = vsub.f32 %v41_v29, %v1973_v41  ;;  %v175_v9 = vsub.f32 %v41_v29, %v1975_v42 }
  0x80   :  { %821 = vperm.xlu1 %1628, %v1836_v11   ;;  %836 = vperm.xlu0 %1629, %v1865_v16  }
  0x81   :  { %v56_v31 = vpop.permute.xlu1 %55  ;;  %v46_v32 = vpop.permute.xlu0 %45 }
  0x82   :  { %v180_v11 = vsub.f32 %v56_v31, %v1973_v41  ;;  %v181_v16 = vsub.f32 %v56_v31, %v1975_v42 }
  0x84   :  { %831 = vperm.xlu1 %1628, %v1848_v13   ;;  %846 = vperm.xlu0 %1629, %v1877_v18   ;;  %v2049_v13 = vrot.slane %v1616_v4, %v170_v37  ;;  %v177_v18 = vsub.f32 %v46_v32, %v1975_v42  ;;  %v2074_v28 = vmul.f32 %v180_v11, %v180_v11 }
  0x85   :  { %v66_v34 = vpop.permute.xlu1 %65  ;;  %v1964_v35 = vpop.permute.xlu0 %60 }
  0x86   :  { %v182_v26 = vsub.f32 %v1964_v35, %v1973_v41  ;;  %v183_v27 = vsub.f32 %v1964_v35, %v1975_v42  ;;  %2990 = vst [vmem:[#allocation6_spill] sm:$0xff] %v2074_v28 }
  0x88   :  { %841 = vperm.xlu1 %1628, %v1860_v15   ;;  %856 = vperm.xlu0 %1629, %v1889_v20   ;;  %v2053_v15 = vrot.slane %v1617_v5, %v166_v36  ;;  %v2060_v20 = vmul.f32 %v178_v6, %v178_v6 }
  0x89   :  { %v76_v39 = vpop.permute.xlu1 %75  ;;  %v1971_v40 = vpop.permute.xlu0 %70 }
  0x8a   :  { %v188_v29 = vsub.f32 %v76_v39, %v1973_v41  ;;  %v189_v30 = vsub.f32 %v76_v39, %v1975_v42  ;;  %v186_v31 = vsub.f32 %v1971_v40, %v1973_v41  ;;  %v187_v35 = vsub.f32 %v1971_v40, %v1975_v42 }
  0x8c   :  { %851 = vperm.xlu1 %1628, %v1872_v17   ;;  %866 = vperm.xlu0 %1629, %v1901_v22   ;;  %v176_v17 = vsub.f32 %v46_v32, %v1973_v41  ;;  %v184_v22 = vsub.f32 %v66_v34, %v1973_v41  ;;  %v238_v6 = vmul.f32 %v188_v29, %v188_v29 }
  0x8d   :  { %v86_v43 = vpop.permute.xlu1 %85  ;;  %v1979_v44 = vpop.permute.xlu0 %80  ;;  %v2103_v40 = vmul.f32 %v186_v31, %v186_v31 }
  0x8e   :  { %v1982_v45 = vsub.f32 %v86_v43, %v1973_v41  ;;  %v1985_v46 = vsub.f32 %v86_v43, %v1975_v42  ;;  %v2086_v36 = vmul.f32 %v176_v17, %v176_v17  ;;  %v234_v38 = vmul.f32 %v184_v22, %v184_v22 }
  0x8f   :  { %v190_v39 = vsub.f32 %v1979_v44, %v1973_v41  ;;  %2994 = vst [vmem:[#allocation10_spill] sm:$0xff] %v2103_v40 }
  0x90   :  { %861 = vperm.xlu1 %1628, %v1884_v19   ;;  %876 = vperm.xlu0 %1629, %v1913_v24   ;;  %v2058_v19 = vrot.slane %v1617_v5, %v170_v37  ;;  %v2066_v24 = vmul.f32 %v174_v8, %v174_v8  ;;  %v2088_v37 = vmul.f32 %v177_v18, %v177_v18 }
  0x91   :  { %v96_v47 = vpop.permute.xlu1 %95  ;;  %v1989_v48 = vpop.permute.xlu0 %90  ;;  %v2122_v18 = vmul.f32 %v190_v39, %v190_v39 }
  0x92   :  { %v1992_v49 = vsub.f32 %v96_v47, %v1973_v41  ;;  %v1995_v50 = vsub.f32 %v96_v47, %v1975_v42  ;;  %v1999_v51 = vsub.f32 %v1989_v48, %v1975_v42  ;;  %v191_v47 = vsub.f32 %v1979_v44, %v1975_v42 }
  0x93   :  { %v194_v4 = vsub.f32 %v1989_v48, %v1973_v41  ;;  %v2110_v44 = vmul.f32 %v187_v35, %v187_v35  ;;  %v2118_v48 = vmul.f32 %v1985_v46, %v1985_v46  ;;  %2996 = vst [vmem:[#allocation12_spill] sm:$0xff] %v2122_v18 }
  0x94   :  { %871 = vperm.xlu1 %1628, %v1896_v21   ;;  %886 = vperm.xlu0 %1629, %v1920_v25   ;;  %v2062_v21 = vmul.f32 %v179_v7, %v179_v7  ;;  %v2068_v25 = vmul.f32 %v175_v9, %v175_v9  ;;  %v239_v7 = vmul.f32 %v189_v30, %v189_v30 }
  0x95   :  { %v106_v52 = vpop.permute.xlu1 %105  ;;  %v101_v53 = vpop.permute.xlu0 %100  ;;  %2995 = vst [vmem:[#allocation11_spill] sm:$0xff] %v2110_v44  ;;  %v2126_v22 = vmul.f32 %v1992_v49, %v1992_v49  ;;  %v2138_v46 = vmul.f32 %v1999_v51, %v1999_v51 }
  0x96   :  { %v2004_v54 = vsub.f32 %v101_v53, %v1973_v41  ;;  %v2007_v55 = vsub.f32 %v101_v53, %v1975_v42  ;;  %2989 = vst [vmem:[#allocation5_spill] sm:$0xff] %v2062_v21  ;;  %v2096_v53 = vmul.f32 %v182_v26, %v182_v26  ;;  %v200_v5 = vsub.f32 %v106_v52, %v1973_v41 }
  0x97   :  { %v201_v8 = vsub.f32 %v106_v52, %v1975_v42  ;;  %v241_v52 = vmul.f32 %v191_v47, %v191_v47  ;;  %v2134_v26 = vmul.f32 %v194_v4, %v194_v4 }
  0x98   :  { %881 = vperm.xlu1 %1628, %v1908_v23   ;;  %v185_v23 = vsub.f32 %v66_v34, %v1975_v42  ;;  %v2084_v34 = vmul.f32 %v181_v16, %v181_v16  ;;  %2992 = vst [vmem:[#allocation8_spill] sm:$0xff] %v2096_v53  ;;  %v2114_v16 = vmul.f32 %v1982_v45, %v1982_v45 }
  0x99   :  { %v2010_v56 = vpop.permute.xlu1 %115  ;;  %v111_v57 = vpop.permute.xlu0 %110  ;;  %v2132_v45 = vmul.f32 %v1995_v50, %v1995_v50  ;;  %v2142_v29 = vmul.f32 %v201_v8, %v201_v8  ;;  %v2146_v49 = vmul.f32 %v2004_v54, %v2004_v54  ;;  %v2156_v51 = vmul.f32 %v2007_v55, %v2007_v55 }
  0x9a   :  { %v2013_v58 = vsub.f32 %v111_v57, %v1973_v41  ;;  %v2016_v59 = vsub.f32 %v111_v57, %v1975_v42  ;;  %2991 = vst [vmem:[#allocation7_spill] sm:$0xff] %v2084_v34  ;;  %v235_v43 = vmul.f32 %v185_v23, %v185_v23  ;;  %v2098_v57 = vmul.f32 %v183_v27, %v183_v27 }
  0x9b   :  { %v204_v17 = vsub.f32 %v2010_v56, %v1973_v41  ;;  %v205_v23 = vsub.f32 %v2010_v56, %v1975_v42  ;;  %v2140_v27 = vmul.f32 %v200_v5, %v200_v5 }
  0x9c   :  { %2993 = vst [vmem:[#allocation9_spill] sm:$0xff] %v2098_v57  ;;  %v2166_v4 = vmul.f32 %v2013_v58, %v2013_v58 }
  0x9d   :  { %v2018_v60 = vpop.permute.xlu1 %125  ;;  %v2020_v61 = vpop.permute.xlu0 %120  ;;  %v2158_v35 = vmul.f32 %v204_v17, %v204_v17  ;;  %v2162_v47 = vmul.f32 %v205_v23, %v205_v23  ;;  %v2178_v23 = vmul.f32 %v2016_v59, %v2016_v59 }
  0x9e   :  { %v208_v56 = vsub.f32 %v2018_v60, %v1973_v41  ;;  %v209_v50 = vsub.f32 %v2018_v60, %v1975_v42  ;;  %v206_v60 = vsub.f32 %v2020_v61, %v1973_v41  ;;  %v207_v5 = vsub.f32 %v2020_v61, %v1975_v42 }
  0xa0   :  { %v2180_v58 = vmul.f32 %v208_v56, %v208_v56  ;;  %v2182_v18 = vmul.f32 %v209_v50, %v209_v50  ;;  %v2194_v59 = vmul.f32 %v206_v60, %v206_v60  ;;  %v2196_v56 = vmul.f32 %v207_v5, %v207_v5 }
  0xa1   :  { %v2022_v62 = vpop.permute.xlu1 %135  ;;  %v2024_v63 = vpop.permute.xlu0 %130 }
  0xa2   :  { %v212_v55 = vsub.f32 %v2022_v62, %v1973_v41  ;;  %v213_v8 = vsub.f32 %v2022_v62, %v1975_v42  ;;  %v210_v44 = vsub.f32 %v2024_v63, %v1973_v41  ;;  %v211_v50 = vsub.f32 %v2024_v63, %v1975_v42 }
  0xa4   :  { %v2202_v53 = vmul.f32 %v212_v55, %v212_v55 }
  0xa5   :  { %v2026_v0 = vpop.permute.xlu1 %145  ;;  %v2028_v1 = vpop.permute.xlu0 %140 }
  0xa6   :  { %v216_v60 = vsub.f32 %v2026_v0, %v1973_v41  ;;  %v217_v5 = vsub.f32 %v2026_v0, %v1975_v42  ;;  %v214_v0 = vsub.f32 %v2028_v1, %v1973_v41 }
  0xa9   :  { %v2030_v2 = vpop.permute.xlu1 %155  ;;  %v2032_v3 = vpop.permute.xlu0 %150 }
  0xad   :  { %v2044_v10 = vpop.permute.xlu0 %160 }
  0xae   :  { %v2051_v14 = vpop.permute.xlu1 %353 }
  0xb2   :  { %v2080_v32 = vpop.permute.xlu1 %363  ;;  %v2082_v33 = vpop.permute.xlu0 %358 }
  0xb6   :  { %v2106_v9 = vpop.permute.xlu1 %368  ;;  %v2108_v11 = vpop.permute.xlu0 %373 }
  0xba   :  { %v379_v30 = vpop.permute.xlu1 %378  ;;  %v2152_v31 = vpop.permute.xlu0 %383 }
  0xbb   :  { %v497_v39 = vsub.f32 %v379_v30, %v2047_v12  ;;  %v498_v54 = vsub.f32 %v379_v30, %v2049_v13 }
  0xbd   :  { %v597_v17 = vmul.f32 %v497_v39, %v497_v39  ;;  %v598_v30 = vmul.f32 %v498_v54, %v498_v54 }
  0xbe   :  { %v389_v61 = vpop.permute.xlu1 %388  ;;  %v2186_v40 = vpop.permute.xlu0 %393 }
  0xbf   :  { %v2188_v34 = vadd.f32 %v597_v17, %v234_v38  ;;  %v2190_v57 = vadd.f32 %v598_v30, %v235_v43  ;;  %v501_v62 = vsub.f32 %v389_v61, %v2047_v12  ;;  %v502_v39 = vsub.f32 %v389_v61, %v2049_v13 }
  0xc0   :  { %v504_v54 = vsub.f32 %v2186_v40, %v2049_v13  ;;  %v2204_v38 = vmul.f32 %v213_v8, %v213_v8  ;;  %v2206_v30 = vmul.f32 %v210_v44, %v210_v44 }
  0xc1   :  { %2997 = vst [vmem:[#allocation13_spill] sm:$0xff] %v2188_v34  ;;  %2998 = vst [vmem:[#allocation14_spill] sm:$0xff] %v2190_v57  ;;  %v601_v43 = vmul.f32 %v501_v62, %v501_v62  ;;  %v602_v17 = vmul.f32 %v502_v39, %v502_v39  ;;  %v2218_v62 = vmul.f32 %v211_v50, %v211_v50 }
  0xc2   :  { %v604_v61 = vmul.f32 %v504_v54, %v504_v54  ;;  %v399_v57 = vpop.permute.xlu1 %398  ;;  %v404_v63 = vpop.permute.xlu0 %403 }
  0xc3   :  { %v2212_v34 = vadd.f32 %v601_v43, %v238_v6  ;;  %v2214_v28 = vadd.f32 %v602_v17, %v239_v7  ;;  %v505_v55 = vsub.f32 %v399_v57, %v2047_v12  ;;  %v506_v8 = vsub.f32 %v399_v57, %v2049_v13 }
  0xc4   :  { %v2220_v44 = vadd.f32 %v604_v61, %v241_v52  ;;  %v507_v39 = vsub.f32 %v404_v63, %v2047_v12  ;;  %v508_v21 = vsub.f32 %v404_v63, %v2049_v13  ;;  %v215_v6 = vsub.f32 %v2028_v1, %v1975_v42 }
  0xc5   :  { %2999 = vst [vmem:[#allocation15_spill] sm:$0xff] %v2212_v34  ;;  %3000 = vst [vmem:[#allocation16_spill] sm:$0xff] %v2214_v28  ;;  %v605_v7 = vmul.f32 %v505_v55, %v505_v55  ;;  %v606_v54 = vmul.f32 %v506_v8, %v506_v8  ;;  %v2228_v43 = vmul.f32 %v216_v60, %v216_v60 }
  0xc6   :  { %v2230_v17 = vmul.f32 %v217_v5, %v217_v5  ;;  %v607_v57 = vmul.f32 %v507_v39, %v507_v39  ;;  %v608_v50 = vmul.f32 %v508_v21, %v508_v21  ;;  %v409_v52 = vpop.permute.xlu1 %408  ;;  %v414_v61 = vpop.permute.xlu0 %413  ;;  %v2248_v8 = vmul.f32 %v214_v0, %v214_v0 }
  0xc7   :  { %v2233_v28 = vadd.f32 %v605_v7, %v2114_v16  ;;  %v2236_v63 = vadd.f32 %v606_v54, %v2118_v48  ;;  %v509_v34 = vsub.f32 %v409_v52, %v2047_v12  ;;  %v510_v1 = vsub.f32 %v409_v52, %v2049_v13 }
  0xc8   :  { %v2241_v55 = vadd.f32 %v607_v57, %v2134_v26  ;;  %v2244_v60 = vadd.f32 %v608_v50, %v2138_v46  ;;  %v511_v21 = vsub.f32 %v414_v61, %v2047_v12  ;;  %v512_v5 = vsub.f32 %v414_v61, %v2049_v13 }
  0xc9   :  { %v2250_v16 = vmul.f32 %v215_v6, %v215_v6  ;;  %v609_v48 = vmul.f32 %v509_v34, %v509_v34  ;;  %v610_v39 = vmul.f32 %v510_v1, %v510_v1  ;;  %v220_v7 = vsub.f32 %v2030_v2, %v1973_v41 }
  0xca   :  { %v221_v26 = vsub.f32 %v2030_v2, %v1975_v42  ;;  %v611_v54 = vmul.f32 %v511_v21, %v511_v21  ;;  %v612_v57 = vmul.f32 %v512_v5, %v512_v5  ;;  %v419_v46 = vpop.permute.xlu1 %418  ;;  %v424_v50 = vpop.permute.xlu0 %423 }
  0xcb   :  { %v2257_v52 = vadd.f32 %v609_v48, %v2126_v22  ;;  %v2260_v0 = vadd.f32 %v610_v39, %v2132_v45  ;;  %v513_v6 = vsub.f32 %v419_v46, %v2047_v12  ;;  %v514_v34 = vsub.f32 %v419_v46, %v2049_v13 }
  0xcc   :  { %v2265_v61 = vadd.f32 %v611_v54, %v2146_v49  ;;  %v2268_v1 = vadd.f32 %v612_v57, %v2156_v51  ;;  %v515_v2 = vsub.f32 %v424_v50, %v2047_v12  ;;  %v516_v21 = vsub.f32 %v424_v50, %v2049_v13 }
  0xcd   :  { %3001 = vst [vmem:[#allocation17_spill] sm:$0xff] %v2257_v52  ;;  %3002 = vst [vmem:[#allocation18_spill] sm:$0xff] %v2260_v0  ;;  %v218_v22 = vsub.f32 %v2032_v3, %v1973_v41  ;;  %v219_v45 = vsub.f32 %v2032_v3, %v1975_v42  ;;  %v613_v5 = vmul.f32 %v513_v6, %v513_v6 }
  0xce   :  { %3003 = vst [vmem:[#allocation19_spill] sm:$0xff] %v2268_v1  ;;  %v614_v48 = vmul.f32 %v514_v34, %v514_v34  ;;  %v2276_v39 = vmul.f32 %v220_v7, %v220_v7  ;;  %v2278_v46 = vmul.f32 %v221_v26, %v221_v26  ;;  %v615_v49 = vmul.f32 %v515_v2, %v515_v2  ;;  %v429_v51 = vpop.permute.xlu1 %428  ;;  %v434_v57 = vpop.permute.xlu0 %433 }
  0xcf   :  { %v616_v54 = vmul.f32 %v516_v21, %v516_v21  ;;  %v663_v0 = vadd.f32 %v613_v5, %v2140_v27  ;;  %v517_v52 = vsub.f32 %v429_v51, %v2047_v12  ;;  %v518_v1 = vsub.f32 %v429_v51, %v2049_v13 }
  0xd0   :  { %v664_v50 = vadd.f32 %v614_v48, %v2142_v29  ;;  %v2285_v3 = vadd.f32 %v615_v49, %v2166_v4  ;;  %v519_v26 = vsub.f32 %v434_v57, %v2047_v12  ;;  %v520_v6 = vsub.f32 %v434_v57, %v2049_v13 }
  0xd1   :  { %v2288_v7 = vadd.f32 %v616_v54, %v2178_v23  ;;  %v2292_v34 = vmul.f32 %v218_v22, %v218_v22  ;;  %v2294_v2 = vmul.f32 %v219_v45, %v219_v45  ;;  %713 = vst [vmem:[#allocation2 + $0xd0] sm:$0xff] %v663_v0  ;;  %v617_v27 = vmul.f32 %v517_v52, %v517_v52 }
  0xd2   :  { %714 = vst [vmem:[#allocation2 + $0xd8] sm:$0xff] %v664_v50  ;;  %v618_v29 = vmul.f32 %v518_v1, %v518_v1  ;;  %v487_v21 = vsub.f32 %v2051_v14, %v2047_v12  ;;  %v488_v4 = vsub.f32 %v2051_v14, %v2049_v13  ;;  %v619_v23 = vmul.f32 %v519_v26, %v519_v26  ;;  %v439_v48 = vpop.permute.xlu1 %438  ;;  %v444_v49 = vpop.permute.xlu0 %443 }
  0xd3   :  { %v620_v5 = vmul.f32 %v520_v6, %v520_v6  ;;  %v667_v54 = vadd.f32 %v617_v27, %v2158_v35  ;;  %v521_v45 = vsub.f32 %v439_v48, %v2047_v12  ;;  %v522_v0 = vsub.f32 %v439_v48, %v2049_v13 }
  0xd4   :  { %v668_v22 = vadd.f32 %v618_v29, %v2162_v47  ;;  %v669_v52 = vadd.f32 %v619_v23, %v2194_v59  ;;  %v523_v51 = vsub.f32 %v444_v49, %v2047_v12  ;;  %v524_v14 = vsub.f32 %v444_v49, %v2049_v13 }
  0xd5   :  { %v670_v1 = vadd.f32 %v620_v5, %v2196_v56  ;;  %v222_v57 = vsub.f32 %v2044_v10, %v1973_v41  ;;  %v223_v35 = vsub.f32 %v2044_v10, %v1975_v42  ;;  %717 = vst [vmem:[#allocation2 + $0xf0] sm:$0xff] %v667_v54  ;;  %v621_v47 = vmul.f32 %v521_v45, %v521_v45 }
  0xd6   :  { %718 = vst [vmem:[#allocation2 + $0xf8] sm:$0xff] %v668_v22  ;;  %v622_v50 = vmul.f32 %v522_v0, %v522_v0  ;;  %v587_v26 = vmul.f32 %v487_v21, %v487_v21  ;;  %v588_v6 = vmul.f32 %v488_v4, %v488_v4  ;;  %719 = vst [vmem:[#allocation2 + $0x100] sm:$0xff] %v669_v52  ;;  %v449_v27 = vpop.permute.xlu1 %448  ;;  %v454_v29 = vpop.permute.xlu0 %453 }
  0xd7   :  { %720 = vst [vmem:[#allocation2 + $0x108] sm:$0xff] %v670_v1  ;;  %v623_v59 = vmul.f32 %v523_v51, %v523_v51  ;;  %v624_v56 = vmul.f32 %v524_v14, %v524_v14  ;;  %v671_v23 = vadd.f32 %v621_v47, %v2180_v58  ;;  %v525_v41 = vsub.f32 %v449_v27, %v2047_v12 }
  0xd8   :  { %v672_v5 = vadd.f32 %v622_v50, %v2182_v18  ;;  %v526_v42 = vsub.f32 %v449_v27, %v2049_v13  ;;  %v527_v21 = vsub.f32 %v454_v29, %v2047_v12  ;;  %v528_v4 = vsub.f32 %v454_v29, %v2049_v13 }
  0xd9   :  { %v673_v10 = vadd.f32 %v623_v59, %v2206_v30  ;;  %v674_v48 = vadd.f32 %v624_v56, %v2218_v62  ;;  %v272_v49 = vmul.f32 %v222_v57, %v222_v57  ;;  %v273_v54 = vmul.f32 %v223_v35, %v223_v35  ;;  %721 = vst [vmem:[#allocation2 + $0x110] sm:$0xff] %v671_v23 }
  0xda   :  { %722 = vst [vmem:[#allocation2 + $0x118] sm:$0xff] %v672_v5  ;;  %v625_v22 = vmul.f32 %v525_v41, %v525_v41  ;;  %v626_v58 = vmul.f32 %v526_v42, %v526_v42  ;;  %v2321_v18 = vadd.f32 %v587_v26, %v2066_v24  ;;  %v2324_v45 = vadd.f32 %v588_v6, %v2068_v25  ;;  %v459_v0 = vpop.permute.xlu1 %458  ;;  %v464_v52 = vpop.permute.xlu0 %463 }
  0xdb   :  { %723 = vst [vmem:[#allocation2 + $0x120] sm:$0xff] %v673_v10  ;;  %724 = vst [vmem:[#allocation2 + $0x128] sm:$0xff] %v674_v48  ;;  %v627_v30 = vmul.f32 %v527_v21, %v527_v21  ;;  %v628_v62 = vmul.f32 %v528_v4, %v528_v4  ;;  %v529_v14 = vsub.f32 %v459_v0, %v2047_v12 }
  0xdc   :  { %v675_v1 = vadd.f32 %v625_v22, %v2202_v53  ;;  %v676_v51 = vadd.f32 %v626_v58, %v2204_v38  ;;  %v530_v57 = vsub.f32 %v459_v0, %v2049_v13  ;;  %v531_v25 = vsub.f32 %v464_v52, %v2047_v12 }
  0xdd   :  { %v677_v24 = vadd.f32 %v627_v30, %v2248_v8  ;;  %v678_v35 = vadd.f32 %v628_v62, %v2250_v16  ;;  %v532_v47 = vsub.f32 %v464_v52, %v2049_v13  ;;  %v491_v50 = vsub.f32 %v2080_v32, %v2047_v12 }
  0xde   :  { %v489_v53 = vsub.f32 %v2082_v33, %v2047_v12  ;;  %725 = vst [vmem:[#allocation2 + $0x130] sm:$0xff] %v675_v1  ;;  %726 = vst [vmem:[#allocation2 + $0x138] sm:$0xff] %v676_v51  ;;  %v629_v38 = vmul.f32 %v529_v14, %v529_v14  ;;  %v630_v26 = vmul.f32 %v530_v57, %v530_v57  ;;  %v469_v56 = vpop.permute.xlu1 %468  ;;  %v474_v27 = vpop.permute.xlu0 %473 }
  0xdf   :  { %v492_v6 = vsub.f32 %v2080_v32, %v2049_v13  ;;  %v490_v8 = vsub.f32 %v2082_v33, %v2049_v13  ;;  %727 = vst [vmem:[#allocation2 + $0x140] sm:$0xff] %v677_v24  ;;  %728 = vst [vmem:[#allocation2 + $0x148] sm:$0xff] %v678_v35  ;;  %v631_v16 = vmul.f32 %v531_v25, %v531_v25 }
  0xe0   :  { %v632_v59 = vmul.f32 %v532_v47, %v532_v47  ;;  %v679_v29 = vadd.f32 %v629_v38, %v2228_v43  ;;  %v680_v23 = vadd.f32 %v630_v26, %v2230_v17  ;;  %v533_v5 = vsub.f32 %v469_v56, %v2047_v12 }
  0xe1   :  { %v534_v41 = vsub.f32 %v469_v56, %v2049_v13  ;;  %v681_v42 = vadd.f32 %v631_v16, %v2292_v34  ;;  %v535_v33 = vsub.f32 %v474_v27, %v2047_v12  ;;  %v536_v10 = vsub.f32 %v474_v27, %v2049_v13 }
  0xe2   :  { %v682_v32 = vadd.f32 %v632_v59, %v2294_v2  ;;  %v591_v48 = vmul.f32 %v491_v50, %v491_v50  ;;  %v589_v21 = vmul.f32 %v489_v53, %v489_v53  ;;  %729 = vst [vmem:[#allocation2 + $0x150] sm:$0xff] %v679_v29  ;;  %730 = vst [vmem:[#allocation2 + $0x158] sm:$0xff] %v680_v23 }
  0xe3   :  { %v633_v4 = vmul.f32 %v533_v5, %v533_v5  ;;  %v634_v43 = vmul.f32 %v534_v41, %v534_v41  ;;  %v592_v22 = vmul.f32 %v492_v6, %v492_v6  ;;  %v590_v17 = vmul.f32 %v490_v8, %v490_v8  ;;  %731 = vst [vmem:[#allocation2 + $0x160] sm:$0xff] %v681_v42  ;;  %v767_v52 = vpop.permute.xlu1 %766  ;;  %v772_v1 = vpop.permute.xlu0 %771 }
  0xe4   :  { %732 = vst [vmem:[#allocation2 + $0x168] sm:$0xff] %v682_v32  ;;  %v635_v58 = vmul.f32 %v535_v33, %v535_v33  ;;  %v636_v30 = vmul.f32 %v536_v10, %v536_v10  ;;  %v493_v34 = vsub.f32 %v2106_v9, %v2047_v12  ;;  %v495_v2 = vsub.f32 %v2108_v11, %v2047_v12  ;;  %v3006_v32 = vld [vmem:[#allocation8_spill] sm:$0xff] }
  0xe5   :  { %v683_v62 = vadd.f32 %v633_v4, %v2276_v39  ;;  %v684_v0 = vadd.f32 %v634_v43, %v2278_v46  ;;  %v900_v57 = vsub.f32 %v767_v52, %v2053_v15  ;;  %v901_v24 = vsub.f32 %v767_v52, %v2058_v19  ;;  %v3008_v52 = vld [vmem:[#allocation7_spill] sm:$0xff] }
  0xe6   :  { %v685_v51 = vadd.f32 %v635_v58, %v272_v49  ;;  %v686_v14 = vadd.f32 %v636_v30, %v273_v54  ;;  %v639_v35 = vadd.f32 %v589_v21, %v2086_v36  ;;  %v494_v25 = vsub.f32 %v2106_v9, %v2049_v13  ;;  %v3007_v30 = vld [vmem:[#allocation9_spill] sm:$0xff] }
  0xe7   :  { %733 = vst [vmem:[#allocation2 + $0x170] sm:$0xff] %v683_v62  ;;  %734 = vst [vmem:[#allocation2 + $0x178] sm:$0xff] %v684_v0  ;;  %v902_v47 = vsub.f32 %v772_v1, %v2053_v15  ;;  %v903_v39 = vsub.f32 %v772_v1, %v2058_v19  ;;  %v640_v46 = vadd.f32 %v590_v17, %v2088_v37  ;;  %v777_v9 = vpop.permute.xlu1 %776  ;;  %v787_v6 = vpop.permute.xlu0 %786 }
  0xe8   :  { %v496_v49 = vsub.f32 %v2108_v11, %v2049_v13  ;;  %735 = vst [vmem:[#allocation2 + $0x180] sm:$0xff] %v685_v51  ;;  %736 = vst [vmem:[#allocation2 + $0x188] sm:$0xff] %v686_v14  ;;  %v1000_v54 = vmul.f32 %v900_v57, %v900_v57  ;;  %v1001_v50 = vmul.f32 %v901_v24, %v901_v24  ;;  %v3009_v24 = vld [vmem:[#allocation10_spill] sm:$0xff] }
  0xe9   :  { %v593_v53 = vmul.f32 %v493_v34, %v493_v34  ;;  %v595_v36 = vmul.f32 %v495_v2, %v495_v2  ;;  %v1002_v38 = vmul.f32 %v902_v47, %v902_v47  ;;  %v1003_v26 = vmul.f32 %v903_v39, %v903_v39 }
  0xea   :  { %v499_v8 = vsub.f32 %v2152_v31, %v2047_v12  ;;  %v500_v16 = vsub.f32 %v2152_v31, %v2049_v13  ;;  %v2371_v37 = vadd.f32 %v1000_v54, %v2321_v18  ;;  %v2374_v11 = vadd.f32 %v1001_v50, %v2324_v45  ;;  %v3004_v45 = vld [vmem:[#allocation5_spill] sm:$0xff] }
  0xeb   :  { %v503_v59 = vsub.f32 %v2186_v40, %v2047_v12  ;;  %v2378_v56 = vadd.f32 %v1002_v38, %v639_v35  ;;  %v2380_v27 = vadd.f32 %v1003_v26, %v640_v46  ;;  %v904_v29 = vsub.f32 %v777_v9, %v2053_v15  ;;  %v3005_v40 = vld [vmem:[#allocation6_spill] sm:$0xff]  ;;  %v782_v10 = vpop.permute.xlu1 %781  ;;  %v797_v21 = vpop.permute.xlu0 %796 }
  0xec   :  { %1630 = vrsqrt.f32 %v2371_v37  ;;  %v905_v23 = vsub.f32 %v777_v9, %v2058_v19  ;;  %v908_v13 = vsub.f32 %v787_v6, %v2053_v15  ;;  %v909_v31 = vsub.f32 %v787_v6, %v2058_v19 }
  0xed   :  { %v641_v18 = vadd.f32 %v591_v48, %v2060_v20  ;;  %v642_v5 = vadd.f32 %v592_v22, %v3004_v45  ;;  %v596_v41 = vmul.f32 %v496_v49, %v496_v49  ;;  %1632 = vrsqrt.f32 %v2374_v11  ;;  %v3011_v49 = vld [vmem:[#allocation12_spill] sm:$0xff] }
  0xee   :  { %v594_v12 = vmul.f32 %v494_v25, %v494_v25  ;;  %v643_v42 = vadd.f32 %v593_v53, %v3005_v40  ;;  %v645_v33 = vadd.f32 %v595_v36, %v3006_v32  ;;  %1634 = vrsqrt.f32 %v2378_v56  ;;  %v3010_v25 = vld [vmem:[#allocation11_spill] sm:$0xff] }
  0xef   :  { %v599_v4 = vmul.f32 %v499_v8, %v499_v8  ;;  %v600_v43 = vmul.f32 %v500_v16, %v500_v16  ;;  %v603_v17 = vmul.f32 %v503_v59, %v503_v59  ;;  %1636 = vrsqrt.f32 %v2380_v27  ;;  %v792_v59 = vpop.permute.xlu1 %791 }
  0xf0   :  { %v1004_v20 = vmul.f32 %v904_v29, %v904_v29  ;;  %v1005_v48 = vmul.f32 %v905_v23, %v905_v23  ;;  %v1008_v22 = vmul.f32 %v908_v13, %v908_v13  ;;  %v1009_v58 = vmul.f32 %v909_v31, %v909_v31  ;;  %v807_v31 = vpop.permute.xlu0 %806 }
  0xf1   :  { %v646_v34 = vadd.f32 %v596_v41, %v3007_v30  ;;  %v906_v2 = vsub.f32 %v782_v10, %v2053_v15  ;;  %v907_v62 = vsub.f32 %v782_v10, %v2058_v19  ;;  %v912_v0 = vsub.f32 %v797_v21, %v2053_v15 }
  0xf2   :  { %v644_v1 = vadd.f32 %v594_v12, %v3008_v52  ;;  %v2399_v51 = vadd.f32 %v1004_v20, %v641_v18  ;;  %v2401_v14 = vadd.f32 %v1005_v48, %v642_v5  ;;  %v2403_v57 = vadd.f32 %v1008_v22, %v645_v33 }
  0xf3   :  { %v649_v35 = vadd.f32 %v599_v4, %v3009_v24  ;;  %v650_v47 = vadd.f32 %v600_v43, %v3010_v25  ;;  %v2407_v39 = vadd.f32 %v1009_v58, %v646_v34  ;;  %v913_v46 = vsub.f32 %v797_v21, %v2058_v19  ;;  %v802_v24 = vpop.permute.xlu1 %801 }
  0xf4   :  { %v2411_v54 = vadd.f32 %v603_v17, %v3011_v49  ;;  %1638 = vrsqrt.f32 %v2399_v51  ;;  %v1006_v50 = vmul.f32 %v906_v2, %v906_v2  ;;  %v1007_v53 = vmul.f32 %v907_v62, %v907_v62 }
  0xf5   :  { %vm1202_vm0 = vcmp.eq.f32.partialorder %v2371_v37, inf  ;;  %vm1204_vm1 = vcmp.eq.f32.partialorder %v2371_v37, 0.0  ;;  %1640 = vrsqrt.f32 %v2401_v14  ;;  %v1012_v36 = vmul.f32 %v912_v0, %v912_v0 }
  0xf6   :  { %v1205_v38 = vand.u32 2147483648, %v2371_v37  ;;  %vm1209_vm2 = vcmp.eq.f32.partialorder %v2374_v11, inf  ;;  %vm1211_vm3 = vcmp.eq.f32.partialorder %v2374_v11, 0.0  ;;  %1642 = vrsqrt.f32 %v2403_v57 }
  0xf7   :  { %v1212_v26 = vand.u32 2147483648, %v2374_v11  ;;  %vm1216_vm4 = vcmp.eq.f32.partialorder %v2378_v56, inf  ;;  %1644 = vrsqrt.f32 %v2407_v39  ;;  %v1013_v9 = vmul.f32 %v913_v46, %v913_v46 }
  0xf8   :  { %vm1218_vm5 = vcmp.eq.f32.partialorder %v2378_v56, 0.0  ;;  %v1219_v6 = vand.u32 2147483648, %v2378_v56  ;;  %v2426_v8 = vadd.f32 %v1006_v50, %v643_v42  ;;  %v2428_v16 = vadd.f32 %v1007_v53, %v644_v1  ;;  %v3012_v50 = vld [vmem:[#allocation13_spill] sm:$0xff] }
  0xf9   :  { %v1631_v29 = vpop.eup %1630  ;;  %vm1223_vm6 = vcmp.eq.f32.partialorder %v2380_v27, inf  ;;  %vm1225_vm7 = vcmp.eq.f32.partialorder %v2380_v27, 0.0  ;;  %v1226_v23 = vand.u32 2147483648, %v2380_v27  ;;  %v2433_v13 = vadd.f32 %v1012_v36, %v649_v35  ;;  %v3013_v36 = vld [vmem:[#allocation14_spill] sm:$0xff] }
  0xfa   :  { %v1633_v18 = vpop.eup %1632  ;;  %v1201_v45 = vmul.f32 %v1631_v29, %v2371_v37  ;;  %v1233_v5 = vand.u32 2147483648, %v2399_v51  ;;  %v1240_v41 = vand.u32 2147483648, %v2401_v14  ;;  %1646 = vrsqrt.f32 %v2426_v8 }
  0xfb   :  { %v1635_v12 = vpop.eup %1634  ;;  %v1208_v40 = vmul.f32 %v1633_v18, %v2374_v11  ;;  %vm1230_vm8 = vcmp.eq.f32.partialorder %v2399_v51, inf  ;;  %1648 = vrsqrt.f32 %v2428_v16  ;;  %v2442_v42 = vadd.f32 %v1013_v9, %v650_v47 }
  0xfc   :  { %v910_v32 = vsub.f32 %v792_v59, %v2053_v15  ;;  %v1637_v33 = vpop.eup %1636  ;;  %v1203_v10 = vsel %vm1202_vm0, %v2371_v37, %v1201_v45  ;;  %v1215_v21 = vmul.f32 %v1635_v12, %v2378_v56  ;;  %vm1232_vm9 = vcmp.eq.f32.partialorder %v2399_v51, 0.0 }
  0xfd   :  { %vm1237_vm10 = vcmp.eq.f32.partialorder %v2401_v14, inf  ;;  %v911_v4 = vsub.f32 %v792_v59, %v2058_v19  ;;  %v916_v43 = vsub.f32 %v807_v31, %v2053_v15  ;;  %v1206_v17 = vsel %vm1204_vm1, %v1205_v38, %v1203_v10 }
  0xfe   :  { %v1210_v20 = vsel %vm1209_vm2, %v2374_v11, %v1208_v40  ;;  %v1222_v48 = vmul.f32 %v1637_v33, %v2380_v27  ;;  %vm1239_vm11 = vcmp.eq.f32.partialorder %v2401_v14, 0.0  ;;  %1650 = vrsqrt.f32 %v2433_v13  ;;  %1550 = vst [vmem:[#allocation2] sm:$0xff] %v1206_v17 }
  0xff   :  { %v1213_v22 = vsel %vm1211_vm3, %v1212_v26, %v1210_v20  ;;  %v1217_v58 = vsel %vm1216_vm4, %v2378_v56, %v1215_v21  ;;  %vm1258_vm12 = vcmp.eq.f32.partialorder %v2403_v57, inf  ;;  %v917_v37 = vsub.f32 %v807_v31, %v2058_v19 }
 0x100   :  { %1551 = vst [vmem:[#allocation2 + $0x8] sm:$0xff] %v1213_v22  ;;  %v1220_v30 = vsel %vm1218_vm5, %v1219_v6, %v1217_v58  ;;  %v1224_v34 = vsel %vm1223_vm6, %v2380_v27, %v1222_v48  ;;  %vm1260_vm13 = vcmp.eq.f32.partialorder %v2403_v57, 0.0  ;;  %1652 = vrsqrt.f32 %v2442_v42  ;;  %v812_v58 = vpop.permute.xlu1 %811 }
 0x101   :  { %v1227_v11 = vsel %vm1225_vm7, %v1226_v23, %v1224_v34  ;;  %1552 = vst [vmem:[#allocation2 + $0x10] sm:$0xff] %v1220_v30  ;;  %v1261_v2 = vand.u32 2147483648, %v2403_v57  ;;  %vm1265_vm14 = vcmp.eq.f32.partialorder %v2407_v39, inf  ;;  %vm1267_vm15 = vcmp.eq.f32.partialorder %v2407_v39, 0.0  ;;  %v1639_v56 = vpop.eup %1638 }
 0x102   :  { %1553 = vst [vmem:[#allocation2 + $0x18] sm:$0xff] %v1227_v11  ;;  %v1268_v62 = vand.u32 2147483648, %v2407_v39  ;;  %v1010_v0 = vmul.f32 %v910_v32, %v910_v32  ;;  %v1011_v52 = vmul.f32 %v911_v4, %v911_v4  ;;  %v1016_v1 = vmul.f32 %v916_v43, %v916_v43  ;;  %v1641_v35 = vpop.eup %1640 }
 0x103   :  { %v1229_v25 = vmul.f32 %v1639_v56, %v2399_v51  ;;  %vm1244_vm0 = vcmp.eq.f32.partialorder %v2426_v8, inf  ;;  %vm1246_vm1 = vcmp.eq.f32.partialorder %v2426_v8, 0.0  ;;  %v1017_v27 = vmul.f32 %v917_v37, %v917_v37  ;;  %v1643_v47 = vpop.eup %1642  ;;  %v3014_v56 = vld [vmem:[#allocation15_spill] sm:$0xff] }
 0x104   :  { %v1236_v46 = vmul.f32 %v1641_v35, %v2401_v14  ;;  %v1247_v49 = vand.u32 2147483648, %v2426_v8  ;;  %v2487_v53 = vadd.f32 %v1010_v0, %v3012_v50  ;;  %v2490_v38 = vadd.f32 %v1011_v52, %v3013_v36  ;;  %v1645_v26 = vpop.eup %1644  ;;  %v3015_v52 = vld [vmem:[#allocation16_spill] sm:$0xff] }
 0x105   :  { %v1231_v9 = vsel %vm1230_vm8, %v2399_v51, %v1229_v25  ;;  %v1257_v6 = vmul.f32 %v1643_v47, %v2403_v57  ;;  %v2497_v59 = vadd.f32 %v1016_v1, %v2411_v54  ;;  %v914_v29 = vsub.f32 %v802_v24, %v2053_v15 }
 0x106   :  { %v1234_v23 = vsel %vm1232_vm9, %v1233_v5, %v1231_v9  ;;  %v1238_v31 = vsel %vm1237_vm10, %v2401_v14, %v1236_v46  ;;  %v1264_v18 = vmul.f32 %v1645_v26, %v2407_v39  ;;  %1654 = vrsqrt.f32 %v2487_v53 }
 0x107   :  { %v1241_v45 = vsel %vm1239_vm11, %v1240_v41, %v1238_v31  ;;  %1554 = vst [vmem:[#allocation2 + $0x20] sm:$0xff] %v1234_v23  ;;  %v1259_v54 = vsel %vm1258_vm12, %v2403_v57, %v1257_v6  ;;  %vm1251_vm2 = vcmp.eq.f32.partialorder %v2428_v16, inf  ;;  %v2514_v51 = vadd.f32 %v1017_v27, %v2220_v44  ;;  %v1647_v5 = vpop.eup %1646  ;;  %v817_v41 = vpop.permute.xlu0 %816 }
 0x108   :  { %1555 = vst [vmem:[#allocation2 + $0x28] sm:$0xff] %v1241_v45  ;;  %v1262_v12 = vsel %vm1260_vm13, %v1261_v2, %v1259_v54  ;;  %v1266_v14 = vsel %vm1265_vm14, %v2407_v39, %v1264_v18  ;;  %vm1253_vm3 = vcmp.eq.f32.partialorder %v2428_v16, 0.0  ;;  %1656 = vrsqrt.f32 %v2490_v38  ;;  %v1649_v40 = vpop.eup %1648 }
 0x109   :  { %v1269_v32 = vsel %vm1267_vm15, %v1268_v62, %v1266_v14  ;;  %1558 = vst [vmem:[#allocation2 + $0x40] sm:$0xff] %v1262_v12  ;;  %v1243_v44 = vmul.f32 %v1647_v5, %v2426_v8  ;;  %v1254_v33 = vand.u32 2147483648, %v2428_v16  ;;  %v915_v57 = vsub.f32 %v802_v24, %v2058_v19  ;;  %v822_v12 = vpop.permute.xlu1 %821 }
 0x10a   :  { %1559 = vst [vmem:[#allocation2 + $0x48] sm:$0xff] %v1269_v32  ;;  %v1250_v10 = vmul.f32 %v1649_v40, %v2428_v16  ;;  %vm1286_vm4 = vcmp.eq.f32.partialorder %v2433_v13, inf  ;;  %1658 = vrsqrt.f32 %v2497_v59  ;;  %v1014_v21 = vmul.f32 %v914_v29, %v914_v29 }
 0x10b   :  { %v1651_v4 = vpop.eup %1650  ;;  %v1245_v39 = vsel %vm1244_vm0, %v2426_v8, %v1243_v44  ;;  %vm1288_vm5 = vcmp.eq.f32.partialorder %v2433_v13, 0.0  ;;  %1660 = vrsqrt.f32 %v2514_v51  ;;  %v920_v43 = vsub.f32 %v817_v41, %v2053_v15  ;;  %v827_v6 = vpop.permute.xlu0 %826 }
 0x10c   :  { %v1248_v17 = vsel %vm1246_vm1, %v1247_v49, %v1245_v39  ;;  %v1252_v20 = vsel %vm1251_vm2, %v2428_v16, %v1250_v10  ;;  %v1285_v48 = vmul.f32 %v1651_v4, %v2433_v13  ;;  %v1289_v22 = vand.u32 2147483648, %v2433_v13 }
 0x10d   :  { %v1653_v37 = vpop.eup %1652  ;;  %v1255_v30 = vsel %vm1253_vm3, %v1254_v33, %v1252_v20  ;;  %1556 = vst [vmem:[#allocation2 + $0x30] sm:$0xff] %v1248_v17  ;;  %vm1293_vm6 = vcmp.eq.f32.partialorder %v2442_v42, inf  ;;  %v1296_v34 = vand.u32 2147483648, %v2442_v42  ;;  %v1015_v8 = vmul.f32 %v915_v57, %v915_v57 }
 0x10e   :  { %1557 = vst [vmem:[#allocation2 + $0x38] sm:$0xff] %v1255_v30  ;;  %v1287_v11 = vsel %vm1286_vm4, %v2433_v13, %v1285_v48  ;;  %v1292_v2 = vmul.f32 %v1653_v37, %v2442_v42  ;;  %v2553_v62 = vadd.f32 %v1014_v21, %v3014_v56  ;;  %v921_v0 = vsub.f32 %v817_v41, %v2058_v19  ;;  %v3016_v30 = vld [vmem:[#allocation19_spill] sm:$0xff] }
 0x10f   :  { %v1290_v16 = vsel %vm1288_vm5, %v1289_v22, %v1287_v11  ;;  %v2559_v1 = vadd.f32 %v1015_v8, %v3015_v52  ;;  %v1020_v24 = vmul.f32 %v920_v43, %v920_v43  ;;  %v918_v35 = vsub.f32 %v812_v58, %v2053_v15  ;;  %v837_v20 = vpop.permute.xlu0 %836 }
 0x110   :  { %v1294_v25 = vsel %vm1293_vm6, %v2442_v42, %v1292_v2  ;;  %vm1295_vm7 = vcmp.eq.f32.partialorder %v2442_v42, 0.0  ;;  %1562 = vst [vmem:[#allocation2 + $0x60] sm:$0xff] %v1290_v16  ;;  %1662 = vrsqrt.f32 %v2553_v62  ;;  %vm1272_vm8 = vcmp.eq.f32.partialorder %v2487_v53, inf }
 0x111   :  { %v1297_v27 = vsel %vm1295_vm7, %v1296_v34, %v1294_v25  ;;  %vm1274_vm9 = vcmp.eq.f32.partialorder %v2487_v53, 0.0  ;;  %1664 = vrsqrt.f32 %v2559_v1  ;;  %v1275_v13 = vand.u32 2147483648, %v2487_v53 }
 0x112   :  { %1563 = vst [vmem:[#allocation2 + $0x68] sm:$0xff] %v1297_v27  ;;  %vm1279_vm10 = vcmp.eq.f32.partialorder %v2490_v38, inf  ;;  %v1021_v47 = vmul.f32 %v921_v0, %v921_v0  ;;  %v2571_v46 = vadd.f32 %v1020_v24, %v2241_v55  ;;  %vm1281_vm11 = vcmp.eq.f32.partialorder %v2490_v38, 0.0 }
 0x113   :  { %v1655_v42 = vpop.eup %1654  ;;  %v1282_v49 = vand.u32 2147483648, %v2490_v38  ;;  %v919_v50 = vsub.f32 %v812_v58, %v2058_v19  ;;  %v1018_v36 = vmul.f32 %v918_v35, %v918_v35  ;;  %vm1314_vm12 = vcmp.eq.f32.partialorder %v2497_v59, inf }
 0x114   :  { %v1271_v26 = vmul.f32 %v1655_v42, %v2487_v53  ;;  %v2579_v9 = vadd.f32 %v1021_v47, %v2244_v60  ;;  %1666 = vrsqrt.f32 %v2571_v46  ;;  %vm1316_vm13 = vcmp.eq.f32.partialorder %v2497_v59, 0.0  ;;  %v3017_v47 = vld [vmem:[#allocation17_spill] sm:$0xff] }
 0x115   :  { %v1657_v55 = vpop.eup %1656  ;;  %v1317_v29 = vand.u32 2147483648, %v2497_v59  ;;  %v1019_v23 = vmul.f32 %v919_v50, %v919_v50  ;;  %v2585_v31 = vadd.f32 %v1018_v36, %v2233_v28  ;;  %vm1321_vm14 = vcmp.eq.f32.partialorder %v2514_v51, inf }
 0x116   :  { %v1273_v18 = vsel %vm1272_vm8, %v2487_v53, %v1271_v26  ;;  %v1278_v45 = vmul.f32 %v1657_v55, %v2490_v38  ;;  %1668 = vrsqrt.f32 %v2579_v9  ;;  %vm1323_vm15 = vcmp.eq.f32.partialorder %v2514_v51, 0.0 }
 0x117   :  { %v1659_v60 = vpop.eup %1658  ;;  %v1276_v54 = vsel %vm1274_vm9, %v1275_v13, %v1273_v18  ;;  %v2597_v5 = vadd.f32 %v1019_v23, %v2236_v63  ;;  %v924_v28 = vsub.f32 %v827_v6, %v2053_v15  ;;  %1670 = vrsqrt.f32 %v2585_v31 }
 0x118   :  { %v1661_v14 = vpop.eup %1660  ;;  %v1280_v41 = vsel %vm1279_vm10, %v2490_v38, %v1278_v45  ;;  %1560 = vst [vmem:[#allocation2 + $0x50] sm:$0xff] %v1276_v54  ;;  %v1313_v40 = vmul.f32 %v1659_v60, %v2497_v59  ;;  %v925_v53 = vsub.f32 %v827_v6, %v2058_v19  ;;  %v1324_v44 = vand.u32 2147483648, %v2514_v51 }
 0x119   :  { %v1283_v32 = vsel %vm1281_vm11, %v1282_v49, %v1280_v41  ;;  %v1320_v63 = vmul.f32 %v1661_v14, %v2514_v51  ;;  %vm1300_vm0 = vcmp.eq.f32.partialorder %v2553_v62, inf  ;;  %vm1302_vm1 = vcmp.eq.f32.partialorder %v2553_v62, 0.0  ;;  %v3018_v49 = vld [vmem:[#allocation18_spill] sm:$0xff] }
 0x11a   :  { %1561 = vst [vmem:[#allocation2 + $0x58] sm:$0xff] %v1283_v32  ;;  %v1315_v33 = vsel %vm1314_vm12, %v2497_v59, %v1313_v40  ;;  %v1303_v57 = vand.u32 2147483648, %v2553_v62  ;;  %1672 = vrsqrt.f32 %v2597_v5  ;;  %vm1307_vm2 = vcmp.eq.f32.partialorder %v2559_v1, inf  ;;  %v976_v40 = vld [vmem:[#allocation2 + $0xd0] sm:$0xff] }
 0x11b   :  { %v1318_v38 = vsel %vm1316_vm13, %v1317_v29, %v1315_v33  ;;  %v1322_v10 = vsel %vm1321_vm14, %v2514_v51, %v1320_v63  ;;  %v1024_v21 = vmul.f32 %v924_v28, %v924_v28  ;;  %v1025_v39 = vmul.f32 %v925_v53, %v925_v53  ;;  %v832_v51 = vpop.permute.xlu1 %831  ;;  %v847_v33 = vpop.permute.xlu0 %846 }
 0x11c   :  { %v1325_v4 = vsel %vm1323_vm15, %v1324_v44, %v1322_v10  ;;  %1566 = vst [vmem:[#allocation2 + $0x80] sm:$0xff] %v1318_v38  ;;  %v922_v43 = vsub.f32 %v822_v12, %v2053_v15  ;;  %v923_v17 = vsub.f32 %v822_v12, %v2058_v19  ;;  %vm1309_vm3 = vcmp.eq.f32.partialorder %v2559_v1, 0.0 }
 0x11d   :  { %v1663_v48 = vpop.eup %1662  ;;  %1567 = vst [vmem:[#allocation2 + $0x88] sm:$0xff] %v1325_v4  ;;  %v1310_v59 = vand.u32 2147483648, %v2559_v1  ;;  %vm1342_vm4 = vcmp.eq.f32.partialorder %v2571_v46, inf  ;;  %v2631_v22 = vadd.f32 %v1024_v21, %v2265_v61  ;;  %v2635_v34 = vadd.f32 %v1025_v39, %v3016_v30 }
 0x11e   :  { %v1665_v58 = vpop.eup %1664  ;;  %v1299_v37 = vmul.f32 %v1663_v48, %v2553_v62  ;;  %v1022_v8 = vmul.f32 %v922_v43, %v922_v43  ;;  %v1023_v11 = vmul.f32 %v923_v17, %v923_v17  ;;  %v928_v56 = vsub.f32 %v837_v20, %v2053_v15 }
 0x11f   :  { %v1306_v2 = vmul.f32 %v1665_v58, %v2559_v1  ;;  %1674 = vrsqrt.f32 %v2631_v22  ;;  %v929_v0 = vsub.f32 %v837_v20, %v2058_v19  ;;  %vm1344_vm5 = vcmp.eq.f32.partialorder %v2571_v46, 0.0  ;;  %v842_v4 = vpop.permute.xlu1 %841 }
 0x120   :  { %v1301_v61 = vsel %vm1300_vm0, %v2553_v62, %v1299_v37  ;;  %1676 = vrsqrt.f32 %v2635_v34  ;;  %v926_v16 = vsub.f32 %v832_v51, %v2053_v15  ;;  %v1345_v25 = vand.u32 2147483648, %v2571_v46 }
 0x121   :  { %v1667_v52 = vpop.eup %1666  ;;  %v1304_v24 = vsel %vm1302_vm1, %v1303_v57, %v1301_v61  ;;  %v1308_v35 = vsel %vm1307_vm2, %v2559_v1, %v1306_v2  ;;  %vm1349_vm6 = vcmp.eq.f32.partialorder %v2579_v9, inf  ;;  %v2658_v42 = vadd.f32 %v1022_v8, %v3017_v47 }
 0x122   :  { %v1311_v27 = vsel %vm1309_vm3, %v1310_v59, %v1308_v35  ;;  %1564 = vst [vmem:[#allocation2 + $0x70] sm:$0xff] %v1304_v24  ;;  %v1341_v13 = vmul.f32 %v1667_v52, %v2571_v46  ;;  %v2661_v62 = vadd.f32 %v1023_v11, %v3018_v49  ;;  %vm1351_vm7 = vcmp.eq.f32.partialorder %v2579_v9, 0.0  ;;  %v983_v52 = vld [vmem:[#allocation2 + $0x108] sm:$0xff]  ;;  %v980_v49 = vld [vmem:[#allocation2 + $0xf0] sm:$0xff] }
 0x123   :  { %v1669_v50 = vpop.eup %1668  ;;  %1565 = vst [vmem:[#allocation2 + $0x78] sm:$0xff] %v1311_v27  ;;  %v1028_v36 = vmul.f32 %v928_v56, %v928_v56  ;;  %v1029_v26 = vmul.f32 %v929_v0, %v929_v0  ;;  %v927_v6 = vsub.f32 %v832_v51, %v2058_v19  ;;  %1678 = vrsqrt.f32 %v2658_v42  ;;  %v857_v51 = vpop.permute.xlu0 %856 }
 0x124   :  { %v1343_v1 = vsel %vm1342_vm4, %v2571_v46, %v1341_v13  ;;  %v1348_v55 = vmul.f32 %v1669_v50, %v2579_v9  ;;  %v1026_v29 = vmul.f32 %v926_v16, %v926_v16  ;;  %v1671_v23 = vpop.eup %1670  ;;  %v1352_v45 = vand.u32 2147483648, %v2579_v9  ;;  %v982_v16 = vld [vmem:[#allocation2 + $0x100] sm:$0xff] }
 0x125   :  { %v1346_v18 = vsel %vm1344_vm5, %v1345_v25, %v1343_v1  ;;  %vm1328_vm8 = vcmp.eq.f32.partialorder %v2585_v31, inf  ;;  %1680 = vrsqrt.f32 %v2661_v62  ;;  %v1327_v54 = vmul.f32 %v1671_v23, %v2585_v31 }
 0x126   :  { %v1350_v60 = vsel %vm1349_vm6, %v2579_v9, %v1348_v55  ;;  %1570 = vst [vmem:[#allocation2 + $0xa0] sm:$0xff] %v1346_v18  ;;  %vm1330_vm9 = vcmp.eq.f32.partialorder %v2585_v31, 0.0  ;;  %v1331_v28 = vand.u32 2147483648, %v2585_v31  ;;  %vm1335_vm10 = vcmp.eq.f32.partialorder %v2597_v5, inf }
 0x127   :  { %v1673_v12 = vpop.eup %1672  ;;  %v1353_v46 = vsel %vm1351_vm7, %v1352_v45, %v1350_v60  ;;  %v2685_v14 = vadd.f32 %v1028_v36, %v2285_v3  ;;  %v2688_v41 = vadd.f32 %v1029_v26, %v2288_v7  ;;  %v1329_v53 = vsel %vm1328_vm8, %v2585_v31, %v1327_v54  ;;  %v977_v7 = vld [vmem:[#allocation2 + $0xd8] sm:$0xff] }
 0x128   :  { %1571 = vst [vmem:[#allocation2 + $0xa8] sm:$0xff] %v1353_v46  ;;  %v1334_v32 = vmul.f32 %v1673_v12, %v2597_v5  ;;  %v1027_v63 = vmul.f32 %v927_v6, %v927_v6  ;;  %v2692_v44 = vadd.f32 %v1026_v29, %v976_v40  ;;  %v1332_v9 = vsel %vm1330_vm9, %v1331_v28, %v1329_v53  ;;  %v981_v26 = vld [vmem:[#allocation2 + $0xf8] sm:$0xff]  ;;  %v852_v12 = vpop.permute.xlu1 %851  ;;  %v986_v53 = vld [vmem:[#allocation2 + $0x120] sm:$0xff] }
 0x129   :  { %vm1337_vm11 = vcmp.eq.f32.partialorder %v2597_v5, 0.0  ;;  %v1338_v57 = vand.u32 2147483648, %v2597_v5  ;;  %1682 = vrsqrt.f32 %v2685_v14  ;;  %1568 = vst [vmem:[#allocation2 + $0x90] sm:$0xff] %v1332_v9  ;;  %vm1370_vm12 = vcmp.eq.f32.partialorder %v2631_v22, inf  ;;  %v987_v9 = vld [vmem:[#allocation2 + $0x128] sm:$0xff] }
 0x12a   :  { %v1336_v3 = vsel %vm1335_vm10, %v2597_v5, %v1334_v32  ;;  %vm1372_vm13 = vcmp.eq.f32.partialorder %v2631_v22, 0.0  ;;  %1684 = vrsqrt.f32 %v2688_v41  ;;  %v1373_v38 = vand.u32 2147483648, %v2631_v22 }
 0x12b   :  { %v1339_v31 = vsel %vm1337_vm11, %v1338_v57, %v1336_v3  ;;  %vm1377_vm14 = vcmp.eq.f32.partialorder %v2635_v34, inf  ;;  %v2703_v10 = vadd.f32 %v1027_v63, %v977_v7  ;;  %vm1379_vm15 = vcmp.eq.f32.partialorder %v2635_v34, 0.0 }
 0x12c   :  { %v1675_v21 = vpop.eup %1674  ;;  %1569 = vst [vmem:[#allocation2 + $0x98] sm:$0xff] %v1339_v31  ;;  %v1380_v5 = vand.u32 2147483648, %v2635_v34  ;;  %vm1356_vm0 = vcmp.eq.f32.partialorder %v2658_v42, inf  ;;  %1686 = vrsqrt.f32 %v2692_v44  ;;  %vm1358_vm1 = vcmp.eq.f32.partialorder %v2658_v42, 0.0 }
 0x12d   :  { %v1677_v39 = vpop.eup %1676  ;;  %v1369_v43 = vmul.f32 %v1675_v21, %v2631_v22  ;;  %v1359_v17 = vand.u32 2147483648, %v2658_v42  ;;  %1688 = vrsqrt.f32 %v2703_v10  ;;  %vm1363_vm2 = vcmp.eq.f32.partialorder %v2661_v62, inf }
 0x12e   :  { %v1376_v20 = vmul.f32 %v1677_v39, %v2635_v34  ;;  %v932_v48 = vsub.f32 %v847_v33, %v2053_v15  ;;  %v933_v59 = vsub.f32 %v847_v33, %v2058_v19  ;;  %vm1365_vm3 = vcmp.eq.f32.partialorder %v2661_v62, 0.0 }
 0x12f   :  { %v1371_v58 = vsel %vm1370_vm12, %v2631_v22, %v1369_v43  ;;  %v930_v37 = vsub.f32 %v842_v4, %v2053_v15  ;;  %v931_v30 = vsub.f32 %v842_v4, %v2058_v19  ;;  %v936_v25 = vsub.f32 %v857_v51, %v2053_v15  ;;  %v862_v43 = vpop.permute.xlu1 %861 }
 0x130   :  { %v1374_v8 = vsel %vm1372_vm13, %v1373_v38, %v1371_v58  ;;  %v1378_v11 = vsel %vm1377_vm14, %v2635_v34, %v1376_v20  ;;  %v1032_v2 = vmul.f32 %v932_v48, %v932_v48  ;;  %v1033_v56 = vmul.f32 %v933_v59, %v933_v59  ;;  %v1679_v0 = vpop.eup %1678 }
 0x131   :  { %v1381_v61 = vsel %vm1379_vm15, %v1380_v5, %v1378_v11  ;;  %1574 = vst [vmem:[#allocation2 + $0xc0] sm:$0xff] %v1374_v8  ;;  %v1030_v24 = vmul.f32 %v930_v37, %v930_v37  ;;  %v1031_v35 = vmul.f32 %v931_v30, %v931_v30  ;;  %v1355_v22 = vmul.f32 %v1679_v0, %v2658_v42  ;;  %v984_v0 = vld [vmem:[#allocation2 + $0x110] sm:$0xff] }
 0x132   :  { %v1681_v27 = vpop.eup %1680  ;;  %1575 = vst [vmem:[#allocation2 + $0xc8] sm:$0xff] %v1381_v61  ;;  %v2732_v13 = vadd.f32 %v1032_v2, %v982_v16  ;;  %v2734_v47 = vadd.f32 %v1033_v56, %v983_v52  ;;  %v937_v50 = vsub.f32 %v857_v51, %v2058_v19  ;;  %v1366_v36 = vand.u32 2147483648, %v2661_v62  ;;  %v985_v61 = vld [vmem:[#allocation2 + $0x118] sm:$0xff] }
 0x133   :  { %v1362_v34 = vmul.f32 %v1681_v27, %v2661_v62  ;;  %vm1398_vm4 = vcmp.eq.f32.partialorder %v2685_v14, inf  ;;  %v2740_v6 = vadd.f32 %v1030_v24, %v980_v49  ;;  %v1357_v1 = vsel %vm1356_vm0, %v2658_v42, %v1355_v22  ;;  %v990_v22 = vld [vmem:[#allocation2 + $0x140] sm:$0xff] }
 0x134   :  { %vm1400_vm5 = vcmp.eq.f32.partialorder %v2685_v14, 0.0  ;;  %1690 = vrsqrt.f32 %v2732_v13  ;;  %v2747_v55 = vadd.f32 %v1031_v35, %v981_v26  ;;  %v1360_v29 = vsel %vm1358_vm1, %v1359_v17, %v1357_v1 }
 0x135   :  { %v1364_v23 = vsel %vm1363_vm2, %v2661_v62, %v1362_v34  ;;  %1692 = vrsqrt.f32 %v2734_v47  ;;  %v1036_v18 = vmul.f32 %v936_v25, %v936_v25  ;;  %1572 = vst [vmem:[#allocation2 + $0xb0] sm:$0xff] %v1360_v29  ;;  %v1401_v54 = vand.u32 2147483648, %v2685_v14 }
 0x136   :  { %v1683_v45 = vpop.eup %1682  ;;  %v1367_v60 = vsel %vm1365_vm3, %v1366_v36, %v1364_v23  ;;  %vm1405_vm6 = vcmp.eq.f32.partialorder %v2688_v41, inf  ;;  %v1037_v28 = vmul.f32 %v937_v50, %v937_v50  ;;  %vm1407_vm7 = vcmp.eq.f32.partialorder %v2688_v41, 0.0 }
 0x137   :  { %v1685_v42 = vpop.eup %1684  ;;  %1573 = vst [vmem:[#allocation2 + $0xb8] sm:$0xff] %v1367_v60  ;;  %v1397_v46 = vmul.f32 %v1683_v45, %v2685_v14  ;;  %v1408_v40 = vand.u32 2147483648, %v2688_v41  ;;  %1694 = vrsqrt.f32 %v2740_v6  ;;  %vm1384_vm8 = vcmp.eq.f32.partialorder %v2692_v44, inf }
 0x138   :  { %v1404_v62 = vmul.f32 %v1685_v42, %v2688_v41  ;;  %vm1386_vm9 = vcmp.eq.f32.partialorder %v2692_v44, 0.0  ;;  %1696 = vrsqrt.f32 %v2747_v55  ;;  %v1387_v33 = vand.u32 2147483648, %v2692_v44 }
 0x139   :  { %v1687_v32 = vpop.eup %1686  ;;  %v1399_v63 = vsel %vm1398_vm4, %v2685_v14, %v1397_v46  ;;  %vm1391_vm10 = vcmp.eq.f32.partialorder %v2703_v10, inf  ;;  %v2772_v57 = vadd.f32 %v1036_v18, %v986_v53  ;;  %v2780_v21 = vadd.f32 %v1037_v28, %v987_v9  ;;  %v991_v18 = vld [vmem:[#allocation2 + $0x148] sm:$0xff] }
 0x13a   :  { %v1689_v3 = vpop.eup %1688  ;;  %v1402_v7 = vsel %vm1400_vm5, %v1401_v54, %v1399_v63  ;;  %v1406_v31 = vsel %vm1405_vm6, %v2688_v41, %v1404_v62  ;;  %v1383_v38 = vmul.f32 %v1687_v32, %v2692_v44  ;;  %vm1393_vm11 = vcmp.eq.f32.partialorder %v2703_v10, 0.0  ;;  %v867_v41 = vpop.permute.xlu0 %866 }
 0x13b   :  { %v1409_v5 = vsel %vm1407_vm7, %v1408_v40, %v1406_v31  ;;  %1578 = vst [vmem:[#allocation2 + $0xe0] sm:$0xff] %v1402_v7  ;;  %v1390_v4 = vmul.f32 %v1689_v3, %v2703_v10  ;;  %1698 = vrsqrt.f32 %v2772_v57  ;;  %v1394_v39 = vand.u32 2147483648, %v2703_v10  ;;  %v988_v40 = vld [vmem:[#allocation2 + $0x130] sm:$0xff] }
 0x13c   :  { %1579 = vst [vmem:[#allocation2 + $0xe8] sm:$0xff] %v1409_v5  ;;  %v1385_v14 = vsel %vm1384_vm8, %v2692_v44, %v1383_v38  ;;  %vm1426_vm12 = vcmp.eq.f32.partialorder %v2732_v13, inf  ;;  %1700 = vrsqrt.f32 %v2780_v21  ;;  %vm1428_vm13 = vcmp.eq.f32.partialorder %v2732_v13, 0.0  ;;  %v989_v38 = vld [vmem:[#allocation2 + $0x138] sm:$0xff] }
 0x13d   :  { %v1388_v17 = vsel %vm1386_vm9, %v1387_v33, %v1385_v14  ;;  %v1392_v20 = vsel %vm1391_vm10, %v2703_v10, %v1390_v4  ;;  %v1429_v48 = vand.u32 2147483648, %v2732_v13  ;;  %vm1433_vm14 = vcmp.eq.f32.partialorder %v2734_v47, inf }
 0x13e   :  { %v1395_v59 = vsel %vm1393_vm11, %v1394_v39, %v1392_v20  ;;  %1576 = vst [vmem:[#allocation2 + $0xd0] sm:$0xff] %v1388_v17  ;;  %v934_v51 = vsub.f32 %v852_v12, %v2053_v15  ;;  %v935_v58 = vsub.f32 %v852_v12, %v2058_v19  ;;  %vm1435_vm15 = vcmp.eq.f32.partialorder %v2734_v47, 0.0  ;;  %v877_v26 = vpop.permute.xlu0 %876 }
 0x13f   :  { %1577 = vst [vmem:[#allocation2 + $0xd8] sm:$0xff] %v1395_v59  ;;  %v940_v44 = vsub.f32 %v867_v41, %v2053_v15  ;;  %v941_v37 = vsub.f32 %v867_v41, %v2058_v19  ;;  %v938_v10 = vsub.f32 %v862_v43, %v2053_v15  ;;  %v1436_v30 = vand.u32 2147483648, %v2734_v47  ;;  %v872_v41 = vpop.permute.xlu1 %871  ;;  %v994_v59 = vld [vmem:[#allocation2 + $0x160] sm:$0xff] }
 0x140   :  { %vm1412_vm0 = vcmp.eq.f32.partialorder %v2740_v6, inf  ;;  %v1034_v8 = vmul.f32 %v934_v51, %v934_v51  ;;  %v1035_v11 = vmul.f32 %v935_v58, %v935_v58  ;;  %vm1414_vm1 = vcmp.eq.f32.partialorder %v2740_v6, 0.0 }
 0x141   :  { %v1691_v2 = vpop.eup %1690  ;;  %v1415_v56 = vand.u32 2147483648, %v2740_v6  ;;  %v1040_v16 = vmul.f32 %v940_v44, %v940_v44  ;;  %v1041_v52 = vmul.f32 %v941_v37, %v941_v37  ;;  %vm1419_vm2 = vcmp.eq.f32.partialorder %v2747_v55, inf }
 0x142   :  { %v1693_v24 = vpop.eup %1692  ;;  %v1425_v35 = vmul.f32 %v1691_v2, %v2732_v13  ;;  %v2813_v25 = vadd.f32 %v1034_v8, %v984_v0  ;;  %v2815_v27 = vadd.f32 %v1035_v11, %v985_v61  ;;  %v939_v34 = vsub.f32 %v862_v43, %v2058_v19  ;;  %v887_v20 = vpop.permute.xlu0 %886 }
 0x143   :  { %v1432_v49 = vmul.f32 %v1693_v24, %v2734_v47  ;;  %v2818_v50 = vadd.f32 %v1040_v16, %v990_v22  ;;  %v1038_v36 = vmul.f32 %v938_v10, %v938_v10  ;;  %vm1421_vm3 = vcmp.eq.f32.partialorder %v2747_v55, 0.0  ;;  %v992_v16 = vld [vmem:[#allocation2 + $0x150] sm:$0xff] }
 0x144   :  { %v1695_v1 = vpop.eup %1694  ;;  %v1427_v29 = vsel %vm1426_vm12, %v2732_v13, %v1425_v35  ;;  %v1422_v23 = vand.u32 2147483648, %v2747_v55  ;;  %1702 = vrsqrt.f32 %v2813_v25  ;;  %v2833_v12 = vadd.f32 %v1041_v52, %v991_v18  ;;  %v993_v52 = vld [vmem:[#allocation2 + $0x158] sm:$0xff] }
 0x145   :  { %v1697_v45 = vpop.eup %1696  ;;  %v1430_v60 = vsel %vm1428_vm13, %v1429_v48, %v1427_v29  ;;  %v1434_v54 = vsel %vm1433_vm14, %v2734_v47, %v1432_v49  ;;  %v1411_v28 = vmul.f32 %v1695_v1, %v2740_v6  ;;  %1704 = vrsqrt.f32 %v2815_v27  ;;  %v998_v1 = vld [vmem:[#allocation2 + $0x180] sm:$0xff] }
 0x146   :  { %v1437_v42 = vsel %vm1435_vm15, %v1436_v30, %v1434_v54  ;;  %1582 = vst [vmem:[#allocation2 + $0x100] sm:$0xff] %v1430_v60  ;;  %v1418_v46 = vmul.f32 %v1697_v45, %v2747_v55  ;;  %v944_v13 = vsub.f32 %v877_v26, %v2053_v15  ;;  %1706 = vrsqrt.f32 %v2818_v50  ;;  %v882_v60 = vpop.permute.xlu1 %881 }
 0x147   :  { %1583 = vst [vmem:[#allocation2 + $0x108] sm:$0xff] %v1437_v42  ;;  %v1413_v62 = vsel %vm1412_vm0, %v2740_v6, %v1411_v28  ;;  %v1039_v53 = vmul.f32 %v939_v34, %v939_v34  ;;  %v2844_v32 = vadd.f32 %v1038_v36, %v988_v40  ;;  %vm1454_vm4 = vcmp.eq.f32.partialorder %v2772_v57, inf }
 0x148   :  { %v1699_v47 = vpop.eup %1698  ;;  %v1416_v63 = vsel %vm1414_vm1, %v1415_v56, %v1413_v62  ;;  %v1420_v33 = vsel %vm1419_vm2, %v2747_v55, %v1418_v46  ;;  %vm1456_vm5 = vcmp.eq.f32.partialorder %v2772_v57, 0.0  ;;  %v1457_v31 = vand.u32 2147483648, %v2772_v57  ;;  %v999_v62 = vld [vmem:[#allocation2 + $0x188] sm:$0xff] }
 0x149   :  { %v1701_v9 = vpop.eup %1700  ;;  %v1423_v3 = vsel %vm1421_vm3, %v1422_v23, %v1420_v33  ;;  %1580 = vst [vmem:[#allocation2 + $0xf0] sm:$0xff] %v1416_v63  ;;  %v1453_v7 = vmul.f32 %v1699_v47, %v2772_v57  ;;  %1708 = vrsqrt.f32 %v2833_v12  ;;  %vm1461_vm6 = vcmp.eq.f32.partialorder %v2780_v21, inf }
 0x14a   :  { %1581 = vst [vmem:[#allocation2 + $0xf8] sm:$0xff] %v1423_v3  ;;  %v1460_v6 = vmul.f32 %v1701_v9, %v2780_v21  ;;  %v945_v5 = vsub.f32 %v877_v26, %v2058_v19  ;;  %v1044_v4 = vmul.f32 %v944_v13, %v944_v13  ;;  %v1464_v55 = vand.u32 2147483648, %v2780_v21 }
 0x14b   :  { %v1455_v14 = vsel %vm1454_vm4, %v2772_v57, %v1453_v7  ;;  %v2863_v39 = vadd.f32 %v1039_v53, %v989_v38  ;;  %1710 = vrsqrt.f32 %v2844_v32  ;;  %vm1463_vm7 = vcmp.eq.f32.partialorder %v2780_v21, 0.0  ;;  %v995_v57 = vld [vmem:[#allocation2 + $0x168] sm:$0xff] }
 0x14c   :  { %v1458_v43 = vsel %vm1456_vm5, %v1457_v31, %v1455_v14  ;;  %v1462_v17 = vsel %vm1461_vm6, %v2780_v21, %v1460_v6  ;;  %v1045_v51 = vmul.f32 %v945_v5, %v945_v5  ;;  %v2871_v58 = vadd.f32 %v1044_v4, %v994_v59 }
 0x14d   :  { %v1465_v48 = vsel %vm1463_vm7, %v1464_v55, %v1462_v17  ;;  %1586 = vst [vmem:[#allocation2 + $0x120] sm:$0xff] %v1458_v43  ;;  %1712 = vrsqrt.f32 %v2863_v39  ;;  %v942_v44 = vsub.f32 %v872_v41, %v2053_v15  ;;  %vm1440_vm8 = vcmp.eq.f32.partialorder %v2813_v25, inf  ;;  %v996_v55 = vld [vmem:[#allocation2 + $0x170] sm:$0xff] }
 0x14e   :  { %1587 = vst [vmem:[#allocation2 + $0x128] sm:$0xff] %v1465_v48  ;;  %v943_v37 = vsub.f32 %v872_v41, %v2058_v19  ;;  %v948_v10 = vsub.f32 %v887_v20, %v2053_v15  ;;  %vm1442_vm9 = vcmp.eq.f32.partialorder %v2813_v25, 0.0  ;;  %v2878_v21 = vadd.f32 %v1045_v51, %v995_v57  ;;  %v997_v41 = vld [vmem:[#allocation2 + $0x178] sm:$0xff] }
 0x14f   :  { %1714 = vrsqrt.f32 %v2871_v58  ;;  %v949_v30 = vsub.f32 %v887_v20, %v2058_v19  ;;  %v1443_v11 = vand.u32 2147483648, %v2813_v25  ;;  %v1042_v2 = vmul.f32 %v942_v44, %v942_v44 }
 0x150   :  { %v1043_v56 = vmul.f32 %v943_v37, %v943_v37  ;;  %v1048_v0 = vmul.f32 %v948_v10, %v948_v10  ;;  %vm1447_vm10 = vcmp.eq.f32.partialorder %v2815_v27, inf  ;;  %vm1449_vm11 = vcmp.eq.f32.partialorder %v2815_v27, 0.0 }
 0x151   :  { %v1703_v8 = vpop.eup %1702  ;;  %1716 = vrsqrt.f32 %v2878_v21  ;;  %v1450_v35 = vand.u32 2147483648, %v2815_v27  ;;  %vm1482_vm12 = vcmp.eq.f32.partialorder %v2818_v50, inf  ;;  %v2889_v22 = vadd.f32 %v1042_v2, %v992_v16 }
 0x152   :  { %v1439_v61 = vmul.f32 %v1703_v8, %v2813_v25  ;;  %v1705_v24 = vpop.eup %1704  ;;  %v2891_v49 = vadd.f32 %v1043_v56, %v993_v52  ;;  %vm1484_vm13 = vcmp.eq.f32.partialorder %v2818_v50, 0.0  ;;  %v1049_v29 = vmul.f32 %v949_v30, %v949_v30 }
 0x153   :  { %v1707_v34 = vpop.eup %1706  ;;  %v1446_v26 = vmul.f32 %v1705_v24, %v2815_v27  ;;  %1718 = vrsqrt.f32 %v2889_v22  ;;  %v2902_v45 = vadd.f32 %v1048_v0, %v998_v1  ;;  %v1485_v42 = vand.u32 2147483648, %v2818_v50 }
 0x154   :  { %v1441_v36 = vsel %vm1440_vm8, %v2813_v25, %v1439_v61  ;;  %v1481_v18 = vmul.f32 %v1707_v34, %v2818_v50  ;;  %vm1489_vm14 = vcmp.eq.f32.partialorder %v2833_v12, inf  ;;  %1720 = vrsqrt.f32 %v2891_v49 }
 0x155   :  { %v1444_v23 = vsel %vm1442_vm9, %v1443_v11, %v1441_v36  ;;  %v1448_v28 = vsel %vm1447_vm10, %v2815_v27, %v1446_v26  ;;  %v1492_v13 = vand.u32 2147483648, %v2833_v12  ;;  %v2919_v63 = vadd.f32 %v1049_v29, %v999_v62 }
 0x156   :  { %v1709_v54 = vpop.eup %1708  ;;  %1584 = vst [vmem:[#allocation2 + $0x110] sm:$0xff] %v1444_v23  ;;  %v1451_v25 = vsel %vm1449_vm11, %v1450_v35, %v1448_v28  ;;  %v1483_v46 = vsel %vm1482_vm12, %v2818_v50, %v1481_v18  ;;  %v946_v33 = vsub.f32 %v882_v60, %v2053_v15  ;;  %v947_v27 = vsub.f32 %v882_v60, %v2058_v19 }
 0x157   :  { %v1488_v40 = vmul.f32 %v1709_v54, %v2833_v12  ;;  %1585 = vst [vmem:[#allocation2 + $0x118] sm:$0xff] %v1451_v25  ;;  %v1486_v47 = vsel %vm1484_vm13, %v1485_v42, %v1483_v46  ;;  %vm1491_vm15 = vcmp.eq.f32.partialorder %v2833_v12, 0.0  ;;  %1722 = vrsqrt.f32 %v2902_v45 }
 0x158   :  { %v1711_v53 = vpop.eup %1710  ;;  %1590 = vst [vmem:[#allocation2 + $0x140] sm:$0xff] %v1486_v47  ;;  %vm1468_vm0 = vcmp.eq.f32.partialorder %v2844_v32, inf  ;;  %v1471_v50 = vand.u32 2147483648, %v2844_v32  ;;  %1724 = vrsqrt.f32 %v2919_v63  ;;  %vm1470_vm1 = vcmp.eq.f32.partialorder %v2844_v32, 0.0 }
 0x159   :  { %v1490_v9 = vsel %vm1489_vm14, %v2833_v12, %v1488_v40  ;;  %v1467_v3 = vmul.f32 %v1711_v53, %v2844_v32  ;;  %vm1475_vm2 = vcmp.eq.f32.partialorder %v2863_v39, inf  ;;  %v1478_v6 = vand.u32 2147483648, %v2863_v39 }
 0x15a   :  { %v1713_v7 = vpop.eup %1712  ;;  %v1493_v31 = vsel %vm1491_vm15, %v1492_v13, %v1490_v9  ;;  %v1046_v38 = vmul.f32 %v946_v33, %v946_v33  ;;  %v1047_v5 = vmul.f32 %v947_v27, %v947_v27  ;;  %vm1477_vm3 = vcmp.eq.f32.partialorder %v2863_v39, 0.0 }
 0x15b   :  { %1591 = vst [vmem:[#allocation2 + $0x148] sm:$0xff] %v1493_v31  ;;  %v1469_v15 = vsel %vm1468_vm0, %v2844_v32, %v1467_v3  ;;  %v1474_v19 = vmul.f32 %v1713_v7, %v2863_v39  ;;  %vm1510_vm4 = vcmp.eq.f32.partialorder %v2871_v58, inf  ;;  %v1513_v59 = vand.u32 2147483648, %v2871_v58 }
 0x15c   :  { %v1472_v12 = vsel %vm1470_vm1, %v1471_v50, %v1469_v15  ;;  %v1715_v4 = vpop.eup %1714  ;;  %v2938_v17 = vadd.f32 %v1046_v38, %v996_v55  ;;  %v2940_v20 = vadd.f32 %v1047_v5, %v997_v41  ;;  %vm1512_vm5 = vcmp.eq.f32.partialorder %v2871_v58, 0.0 }
 0x15d   :  { %v1476_v14 = vsel %vm1475_vm2, %v2863_v39, %v1474_v19  ;;  %1588 = vst [vmem:[#allocation2 + $0x130] sm:$0xff] %v1472_v12  ;;  %v1509_v32 = vmul.f32 %v1715_v4, %v2871_v58  ;;  %vm1517_vm6 = vcmp.eq.f32.partialorder %v2878_v21, inf  ;;  %v1520_v57 = vand.u32 2147483648, %v2878_v21 }
 0x15e   :  { %v1479_v43 = vsel %vm1477_vm3, %v1478_v6, %v1476_v14  ;;  %v1717_v48 = vpop.eup %1716  ;;  %1726 = vrsqrt.f32 %v2938_v17  ;;  %vm1519_vm7 = vcmp.eq.f32.partialorder %v2878_v21, 0.0  ;;  %vm1496_vm8 = vcmp.eq.f32.partialorder %v2889_v22, inf }
 0x15f   :  { %1589 = vst [vmem:[#allocation2 + $0x138] sm:$0xff] %v1479_v43  ;;  %v1511_v51 = vsel %vm1510_vm4, %v2871_v58, %v1509_v32  ;;  %v1516_v39 = vmul.f32 %v1717_v48, %v2878_v21  ;;  %1728 = vrsqrt.f32 %v2940_v20  ;;  %v1499_v11 = vand.u32 2147483648, %v2889_v22 }
 0x160   :  { %v1514_v44 = vsel %vm1512_vm5, %v1513_v59, %v1511_v51  ;;  %v1719_v37 = vpop.eup %1718  ;;  %vm1498_vm9 = vcmp.eq.f32.partialorder %v2889_v22, 0.0  ;;  %vm1503_vm10 = vcmp.eq.f32.partialorder %v2891_v49, inf  ;;  %vm1505_vm11 = vcmp.eq.f32.partialorder %v2891_v49, 0.0 }
 0x161   :  { %v1518_v10 = vsel %vm1517_vm6, %v2878_v21, %v1516_v39  ;;  %1594 = vst [vmem:[#allocation2 + $0x160] sm:$0xff] %v1514_v44  ;;  %v1721_v30 = vpop.eup %1720  ;;  %v1495_v58 = vmul.f32 %v1719_v37, %v2889_v22  ;;  %v1506_v21 = vand.u32 2147483648, %v2891_v49  ;;  %vm1538_vm12 = vcmp.eq.f32.partialorder %v2902_v45, inf }
 0x162   :  { %v1521_v8 = vsel %vm1519_vm7, %v1520_v57, %v1518_v10  ;;  %v1502_v2 = vmul.f32 %v1721_v30, %v2891_v49  ;;  %vm1540_vm13 = vcmp.eq.f32.partialorder %v2902_v45, 0.0  ;;  %vm1545_vm14 = vcmp.eq.f32.partialorder %v2919_v63, inf }
 0x163   :  { %1595 = vst [vmem:[#allocation2 + $0x168] sm:$0xff] %v1521_v8  ;;  %v1497_v56 = vsel %vm1496_vm8, %v2889_v22, %v1495_v58  ;;  %v1541_v22 = vand.u32 2147483648, %v2902_v45  ;;  %vm1547_vm15 = vcmp.eq.f32.partialorder %v2919_v63, 0.0  ;;  %vm1524_vm0 = vcmp.eq.f32.partialorder %v2938_v17, inf }
 0x164   :  { %v1723_v0 = vpop.eup %1722  ;;  %v1500_v61 = vsel %vm1498_vm9, %v1499_v11, %v1497_v56  ;;  %v1504_v16 = vsel %vm1503_vm10, %v2891_v49, %v1502_v2  ;;  %v1548_v49 = vand.u32 2147483648, %v2919_v63  ;;  %vm1526_vm1 = vcmp.eq.f32.partialorder %v2938_v17, 0.0 }
 0x165   :  { %v1725_v52 = vpop.eup %1724  ;;  %v1507_v24 = vsel %vm1505_vm11, %v1506_v21, %v1504_v16  ;;  %1592 = vst [vmem:[#allocation2 + $0x150] sm:$0xff] %v1500_v61  ;;  %v1537_v35 = vmul.f32 %v1723_v0, %v2902_v45  ;;  %vm1531_vm2 = vcmp.eq.f32.partialorder %v2940_v20, inf  ;;  %v1534_v42 = vand.u32 2147483648, %v2940_v20 }
 0x166   :  { %1593 = vst [vmem:[#allocation2 + $0x158] sm:$0xff] %v1507_v24  ;;  %v1544_v34 = vmul.f32 %v1725_v52, %v2919_v63  ;;  %vm1533_vm3 = vcmp.eq.f32.partialorder %v2940_v20, 0.0 }
 0x167   :  { %v1539_v36 = vsel %vm1538_vm12, %v2902_v45, %v1537_v35  ;;  %v1527_v45 = vand.u32 2147483648, %v2938_v17 }
 0x168   :  { %v1542_v26 = vsel %vm1540_vm13, %v1541_v22, %v1539_v36  ;;  %v1546_v1 = vsel %vm1545_vm14, %v2919_v63, %v1544_v34 }
 0x169   :  { %v1549_v29 = vsel %vm1547_vm15, %v1548_v49, %v1546_v1  ;;  %1598 = vst [vmem:[#allocation2 + $0x180] sm:$0xff] %v1542_v26 }
 0x16a   :  { %1599 = vst [vmem:[#allocation2 + $0x188] sm:$0xff] %v1549_v29 }
 0x16b   :  { %v1727_v23 = vpop.eup %1726 }
 0x16c   :  { %v1729_v18 = vpop.eup %1728  ;;  %v1523_v60 = vmul.f32 %v1727_v23, %v2938_v17 }
 0x16d   :  { %v1530_v54 = vmul.f32 %v1729_v18, %v2940_v20 }
 0x16e   :  { %v1525_v28 = vsel %vm1524_vm0, %v2938_v17, %v1523_v60 }
 0x16f   :  { %v1528_v25 = vsel %vm1526_vm1, %v1527_v45, %v1525_v28  ;;  %v1532_v46 = vsel %vm1531_vm2, %v2940_v20, %v1530_v54 }
 0x170   :  { %v1535_v40 = vsel %vm1533_vm3, %v1534_v42, %v1532_v46  ;;  %1596 = vst [vmem:[#allocation2 + $0x170] sm:$0xff] %v1528_v25 }
 0x171   :  { %1597 = vst [vmem:[#allocation2 + $0x178] sm:$0xff] %v1535_v40 }
 0x172   :  { %1741 = shalt.err (!%p1738_p4)
}
 0x173   :  { %s1756_s10 = smov 256   ;;  %s1757_s11 = smov 16  }
 0x174   :  { %1611 = dma.vmem_to_hbm [thread:$0]  %s1606_s8, 6400, %s2988_s2, [#allocation3], %s1756_s10, %s1756_s10, %s1757_s11  }
 0x175   :  { %1750 = dma.done.wait [#allocation3], 6400  }
 0x176   :  { %1751 = vsyncadd [#allocation3], 4294960896 }
 0x177   :  { %1615 = vsyncpa [#allocation3], 1 }

</bundles_post_ra>
